<compile_context>
chip_gen: v7x
topology: tpu7x:2x2x1
jax: 0.10.0
libtpu: 0.0.40
codegen_flags: <defaults>
</compile_context>

<pallas_src>
import math

import jax
import jax.numpy as jnp
import numpy as np
from jax.experimental import pallas as pl
from jax.experimental.pallas import tpu as pltpu

# ----------------------------- architecture constants ------------------------
LATENT = 16
INPUT_LATENT_DIM = 4
SNAIL_IN = LATENT + INPUT_LATENT_DIM              # 20
TC_FILTERS = 8
TC_DILATIONS = (1, 2, 4)                          # ceil(log2(seq_len)) blocks
KEY_SIZE = 8
VALUE_SIZE = 8
PRE_OUT = 5
SEQ_LEN = 8
IMG_HW = 16
SLAB_LANES = 128                                  # lane-padded running channel slab
ATTN_IN = SNAIL_IN + len(TC_DILATIONS) * TC_FILTERS   # 44
PREOUT_LANE = ATTN_IN + VALUE_SIZE                     # 52
VALUE_IN = PREOUT_LANE + (PRE_OUT - 1)                 # 56

# ------------------------- weight-slab row layout -----------------------------
OFF_RCAT1 = 0                      # (192,128) conv1 H-gather, 3 blocks of 64
OFF_C1 = OFF_RCAT1 + 192           # (144, 64) conv1 (W-gather ⊗ weight), 3x48
OFF_RCAT2 = OFF_C1 + 144           # ( 96, 64) conv2 H-gather, 3 blocks of 32
OFF_C2 = OFF_RCAT2 + 96            # (192, 32) conv2 (W-gather ⊗ weight) dw-summed
OFF_FCAT = OFF_C2 + 192            # ( 32, 32) fc row selection, 4 blocks of 8
OFF_WFCB = OFF_FCAT + 32           # (128, 16) fc weight blocks, 4 blocks of 32
OFF_WTC = OFF_WFCB + 128           # (384, 16) TC fused gate weights, 3 blocks of 128
OFF_WQKV = OFF_WTC + 384           # (128, 24) stacked q|k|v projection
OFF_WV1 = OFF_WQKV + 128           # (128, 32) value-head layer 1
OFF_WV2 = OFF_WV1 + 128            # ( 32,  1) value-head layer 2
W_ROWS = OFF_WV2 + 32              # 1456 rows total

VMEM_SPEC = pl.BlockSpec(memory_space=pltpu.MemorySpace.VMEM)


# ------------------------------- fused kernel --------------------------------
def _fused_kernel(img_ref, seed_ref, w_ref, b_ref, o_ref):
    # img_ref : (128, 48)  image, rows=(t,h), lanes=(c,w)
    # seed_ref: (8, 128)   input_latent @ lanes 16..19, preout[:-1] @ lanes 52..55
    # w_ref   : (1456,128) packed weight slab
    # b_ref   : (8, 128)   packed bias slab
    # o_ref   : (8, 1)     agent value per time step
    f32 = jnp.float32
    b = b_ref[...]                                                   # (8,128)

    # ------------------------------ conv1 + ReLU -----------------------------
    # m1[(dh,t,ho),(c,w)] = img[t, c, 2ho+dh-1, w] (0 if OOB)
    m1 = jnp.dot(w_ref[OFF_RCAT1:OFF_RCAT1 + 192, :], img_ref[...],
                 preferred_element_type=f32)                         # (192,48)
    p0 = jnp.dot(m1[0:64, :], w_ref[OFF_C1:OFF_C1 + 48, 0:64],
                 preferred_element_type=f32)
    p1 = jnp.dot(m1[64:128, :], w_ref[OFF_C1 + 48:OFF_C1 + 96, 0:64],
                 preferred_element_type=f32)
    p2 = jnp.dot(m1[128:192, :], w_ref[OFF_C1 + 96:OFF_C1 + 144, 0:64],
                 preferred_element_type=f32)
    # y1[t*8+ho, wo*8+co] = relu(conv1)[t, co, ho, wo]
    y1 = jnp.maximum((p0 + p1) + (p2 + b[0:1, 0:64]), 0.0)           # (64,64)

    # ------------------------------ conv2 + ReLU -----------------------------
    m2 = jnp.dot(w_ref[OFF_RCAT2:OFF_RCAT2 + 96, 0:64], y1,
                 preferred_element_type=f32)                         # (96,64)
    q0 = jnp.dot(m2[0:32, :], w_ref[OFF_C2:OFF_C2 + 64, 0:32],
                 preferred_element_type=f32)
    q1 = jnp.dot(m2[32:64, :], w_ref[OFF_C2 + 64:OFF_C2 + 128, 0:32],
                 preferred_element_type=f32)
    q2 = jnp.dot(m2[64:96, :], w_ref[OFF_C2 + 128:OFF_C2 + 192, 0:32],
                 preferred_element_type=f32)
    # y2[t*4+ho2, wo2*8+co] = relu(conv2)[t, co, ho2, wo2]
    y2 = jnp.maximum((q0 + q1) + (q2 + b[1:2, 0:32]), 0.0)           # (32,32)

    # ------------------------- fc (Flatten + Linear) --------------------------
    m3 = jnp.dot(w_ref[OFF_FCAT:OFF_FCAT + 32, 0:32], y2,
                 preferred_element_type=f32)                         # (32,32)
    r0 = jnp.dot(m3[0:8, :], w_ref[OFF_WFCB:OFF_WFCB + 32, 0:LATENT],
                 preferred_element_type=f32)
    r1 = jnp.dot(m3[8:16, :], w_ref[OFF_WFCB + 32:OFF_WFCB + 64, 0:LATENT],
                 preferred_element_type=f32)
    r2 = jnp.dot(m3[16:24, :], w_ref[OFF_WFCB + 64:OFF_WFCB + 96, 0:LATENT],
                 preferred_element_type=f32)
    r3 = jnp.dot(m3[24:32, :], w_ref[OFF_WFCB + 96:OFF_WFCB + 128, 0:LATENT],
                 preferred_element_type=f32)
    lat = (r0 + r1) + (r2 + r3) + b[2:3, 0:LATENT]                   # (8,16)

    # --------------- SNAIL running state: one register-resident vreg ----------
    # seed already carries input_latent (lanes 16..19) and preout (lanes 52..55).
    x = seed_ref[...] + jnp.pad(lat, ((0, 0), (0, SLAB_LANES - LATENT)))   # (8,128)
    rows2d = jax.lax.broadcasted_iota(jnp.int32, (SEQ_LEN, SLAB_LANES), 0)

    # ------------------------------ TCBlock -----------------------------------
    size = SNAIL_IN
    for i, d in enumerate(TC_DILATIONS):
        # dilated causal shift x[t-d] via sublane roll (XLU) + zero-fill t<d
        x_shift = pltpu.roll(x, shift=d, axis=0)
        x_shift = jnp.where(rows2d >= d, x_shift, 0.0)
        # pack: lanes 0..63 = current x[t], lanes 64..127 = shifted x[t-d]
        packed = x + pltpu.roll(x_shift, shift=64, axis=1)
        w_i = w_ref[OFF_WTC + 128 * i:OFF_WTC + 128 * (i + 1), 0:2 * TC_FILTERS]
        y = jnp.dot(packed, w_i, preferred_element_type=f32) + b[3 + i:4 + i, 0:16]
        act = jnp.tanh(y[:, 0:TC_FILTERS]) * jax.nn.sigmoid(y[:, TC_FILTERS:2 * TC_FILTERS])
        x = x + jnp.pad(act, ((0, 0), (size, SLAB_LANES - size - TC_FILTERS)))
        size += TC_FILTERS

    # --------------------------- AttentionBlock -------------------------------
    qkv = jnp.dot(x, w_ref[OFF_WQKV:OFF_WQKV + 128, 0:24],
                  preferred_element_type=f32) + b[6:7, 0:24]         # (8,24)
    q = qkv[:, 0:KEY_SIZE]
    k = qkv[:, KEY_SIZE:2 * KEY_SIZE]
    v = qkv[:, 2 * KEY_SIZE:2 * KEY_SIZE + VALUE_SIZE]
    logits = jax.lax.dot_general(q, k, dimension_numbers=(((1,), (1,)), ((), ())),
                                 preferred_element_type=f32)         # q @ k^T, (8,8)
    logits = logits * (1.0 / math.sqrt(KEY_SIZE))
    row8 = jax.lax.broadcasted_iota(jnp.int32, (SEQ_LEN, SEQ_LEN), 0)
    col8 = jax.lax.broadcasted_iota(jnp.int32, (SEQ_LEN, SEQ_LEN), 1)
    logits = jnp.where(col8 <= row8, logits, -1e30)                  # causal mask
    mmax = jnp.max(logits, axis=-1, keepdims=True)
    pexp = jnp.exp(logits - mmax)
    denom = jnp.sum(pexp, axis=-1, keepdims=True)
    attn = pexp * pl.reciprocal(denom, approx=True)
    aout = jnp.dot(attn, v, preferred_element_type=f32)              # (8,8)
    x = x + jnp.pad(aout, ((0, 0), (size, SLAB_LANES - size - VALUE_SIZE)))
    # pre_output_latent[:-1] is already in lanes 52..55 from the seed.

    # ---------------------------- value head ----------------------------------
    h = jnp.maximum(jnp.dot(x, w_ref[OFF_WV1:OFF_WV1 + 128, 0:32],
                            preferred_element_type=f32) + b[7:8, 0:32], 0.0)
    o_ref[...] = (jnp.dot(h, w_ref[OFF_WV2:OFF_WV2 + 32, 0:1],
                          preferred_element_type=f32) + b[7:8, 32:33])


_fused_call = pl.pallas_call(
    _fused_kernel,
    out_shape=jax.ShapeDtypeStruct((SEQ_LEN, 1), jnp.float32),
    in_specs=[VMEM_SPEC] * 4,
    out_specs=VMEM_SPEC,
)


# ------------------------ host-side parameter packing ------------------------
def prepare_params(p):
    """Fold / kron / pad the raw params into one weight slab and one bias slab."""
    w1 = np.asarray(p["conv1"][0]); b1 = np.asarray(p["conv1"][1])
    w2 = np.asarray(p["conv2"][0]); b2 = np.asarray(p["conv2"][1])
    wfc = np.asarray(p["fc"][0]);   bfc = np.asarray(p["fc"][1])
    eye8 = np.eye(8, dtype=np.float32)

    # conv1: row gather (per dh) + (W-gather ⊗ weight), dw folded into C1
    rcat1 = np.zeros((192, 128), np.float32)
    c1 = np.zeros((3, 48, 64), np.float32)
    for dh in range(3):
        A = np.zeros((8, 16), np.float32)
        for ho in range(8):
            h = 2 * ho + dh - 1
            if 0 <= h < IMG_HW:
                A[ho, h] = 1.0
        rcat1[64 * dh:64 * (dh + 1)] = np.kron(eye8, A)        # rows (t,ho) <- (t,h)
        for c in range(3):
            for wo in range(8):
                for dw in range(3):
                    w = 2 * wo + dw - 1
                    if 0 <= w < IMG_HW:
                        c1[dh, c * 16 + w, wo * 8:wo * 8 + 8] += w1[:, c, dh, dw]
    b1k = np.tile(b1.reshape(1, 8), (1, 8))                    # (1,64)

    # conv2: row gather + dw-pre-summed (W-gather ⊗ weight)
    rcat2 = np.zeros((96, 64), np.float32)
    c2 = np.zeros((3, 64, 32), np.float32)
    for dh in range(3):
        A = np.zeros((4, 8), np.float32)
        for ho2 in range(4):
            h = 2 * ho2 + dh - 1
            if 0 <= h < 8:
                A[ho2, h] = 1.0
        rcat2[32 * dh:32 * (dh + 1)] = np.kron(eye8, A)
        for dw in range(3):
            B = np.zeros((8, 4), np.float32)
            for wo2 in range(4):
                w = 2 * wo2 + dw - 1
                if 0 <= w < 8:
                    B[w, wo2] = 1.0
            c2[dh] += np.kron(B, w2[:, :, dh, dw].T)           # (wo,ci)->(wo2,co)
    b2k = np.tile(b2.reshape(1, 8), (1, 4))                    # (1,32)

    # fc: row selection + per-ho2 weight blocks (torch NCHW flatten order)
    fcat = np.zeros((32, 32), np.float32)
    for ho2 in range(4):
        for t in range(8):
            fcat[ho2 * 8 + t, t * 4 + ho2] = 1.0
    wfcb = np.transpose(wfc.reshape(8, 4, 4, LATENT), (1, 2, 0, 3)).reshape(128, LATENT)

    # TCBlock: fuse [current | shifted] gate weights into one (128,16) per dilation
    wtc = np.zeros((384, 16), np.float32)
    btc = np.zeros((3, 16), np.float32)
    for i, ((wf, bf, wg, bg), _d) in enumerate(p["tc"]):
        wf = np.asarray(wf); wg = np.asarray(wg)
        s = wf.shape[0] // 2
        wfg = np.concatenate([wf, wg], axis=1)                 # (2s,16)
        wtc[128 * i:128 * i + s] = wfg[s:]                     # current x[t] rows
        wtc[128 * i + 64:128 * i + 64 + s] = wfg[:s]           # shifted x[t-d] rows
        btc[i] = np.concatenate([np.asarray(bf), np.asarray(bg)], axis=1).reshape(16)

    # attention q|k|v
    wq, bq, wk, bk, wv, bv = [np.asarray(a) for a in p["attn"]]
    wqkv = np.zeros((128, 24), np.float32)
    wqkv[:wq.shape[0]] = np.concatenate([wq, wk, wv], axis=1)
    bqkv = np.concatenate([bq, bk, bv], axis=1).reshape(24)

    # value head
    wv1_raw = np.asarray(p["val1"][0]); bv1 = np.asarray(p["val1"][1])
    wv2 = np.asarray(p["val2"][0]);     bv2 = np.asarray(p["val2"][1])
    wv1 = np.zeros((128, 32), np.float32)
    wv1[:wv1_raw.shape[0]] = wv1_raw

    # pack into slabs
    wslab = np.zeros((W_ROWS, SLAB_LANES), np.float32)
    wslab[OFF_RCAT1:OFF_RCAT1 + 192, 0:128] = rcat1
    wslab[OFF_C1:OFF_C1 + 144, 0:64] = c1.reshape(144, 64)
    wslab[OFF_RCAT2:OFF_RCAT2 + 96, 0:64] = rcat2
    wslab[OFF_C2:OFF_C2 + 192, 0:32] = c2.reshape(192, 32)
    wslab[OFF_FCAT:OFF_FCAT + 32, 0:32] = fcat
    wslab[OFF_WFCB:OFF_WFCB + 128, 0:LATENT] = wfcb
    wslab[OFF_WTC:OFF_WTC + 384, 0:16] = wtc
    wslab[OFF_WQKV:OFF_WQKV + 128, 0:24] = wqkv
    wslab[OFF_WV1:OFF_WV1 + 128, 0:32] = wv1
    wslab[OFF_WV2:OFF_WV2 + 32, 0:1] = wv2

    bslab = np.zeros((8, SLAB_LANES), np.float32)
    bslab[0, 0:64] = b1k.reshape(64)
    bslab[1, 0:32] = b2k.reshape(32)
    bslab[2, 0:LATENT] = bfc.reshape(LATENT)
    bslab[3:6, 0:16] = btc
    bslab[6, 0:24] = bqkv
    bslab[7, 0:32] = bv1.reshape(32)
    bslab[7, 32] = bv2.reshape(1)[0]

    return dict(wslab=jnp.asarray(wslab), bslab=jnp.asarray(bslab))


# --------------------------------- forward -----------------------------------
@jax.jit
def mimetic_snail_critic_forward(kp, image_seq, input_latent, pre_output_latent):
    """image_seq: (T,3,16,16), input_latent: (4,T), pre_output_latent: (5,T).
    Returns (T,) agent values — matches the PyTorch 4-D input path."""
    assert image_seq.shape == (SEQ_LEN, 3, IMG_HW, IMG_HW), image_seq.shape
    img2d = jnp.transpose(image_seq, (0, 2, 1, 3)).reshape(SEQ_LEN * IMG_HW, 3 * IMG_HW)
    seed = jnp.zeros((SEQ_LEN, SLAB_LANES), jnp.float32)
    seed = seed.at[:, LATENT:SNAIL_IN].set(jnp.transpose(input_latent))
    seed = seed.at[:, PREOUT_LANE:VALUE_IN].set(jnp.transpose(pre_output_latent[:-1]))
    out = _fused_call(img2d, seed, kp["wslab"], kp["bslab"])
    return out[:, 0]                                           # squeeze(1)


# --------------------------- deterministic params ----------------------------
def _init_linear(key, fan_in, fan_out):
    kw, kb = jax.random.split(key)
    bound = 1.0 / math.sqrt(fan_in)
    w = jax.random.uniform(kw, (fan_in, fan_out), jnp.float32, -bound, bound)
    b = jax.random.uniform(kb, (1, fan_out), jnp.float32, -bound, bound)
    return w, b


def _init_conv(key, cin, cout, k):
    kw, kb = jax.random.split(key)
    bound = 1.0 / math.sqrt(cin * k * k)
    w = jax.random.uniform(kw, (cout, cin, k, k), jnp.float32, -bound, bound)
    b = jax.random.uniform(kb, (1, cout), jnp.float32, -bound, bound)
    return w, b


def init_params(key):
    ks = jax.random.split(key, 16)
    p = {}
    p["conv1"] = _init_conv(ks[0], 3, 8, 3)
    p["conv2"] = _init_conv(ks[1], 8, 8, 3)
    p["fc"] = _init_linear(ks[2], 8 * 4 * 4, LATENT)
    tc = []
    size = SNAIL_IN
    for i, d in enumerate(TC_DILATIONS):
        wf, bf = _init_linear(ks[3 + 2 * i], 2 * size, TC_FILTERS)
        wg, bg = _init_linear(ks[4 + 2 * i], 2 * size, TC_FILTERS)
        tc.append(((wf, bf, wg, bg), d))
        size += TC_FILTERS
    p["tc"] = tc
    wq, bq = _init_linear(ks[9], size, KEY_SIZE)
    wk, bk = _init_linear(ks[10], size, KEY_SIZE)
    wv, bv = _init_linear(ks[11], size, VALUE_SIZE)
    p["attn"] = (wq, bq, wk, bk, wv, bv)
    size += VALUE_SIZE
    size += PRE_OUT - 1
    p["val1"] = _init_linear(ks[12], size, 32)
    p["val2"] = _init_linear(ks[13], 32, 1)
    return p


# ----------------------------------- main -------------------------------------
if __name__ == "__main__":
    key = jax.random.PRNGKey(0)
    k_img, k_lat, k_pre, k_par = jax.random.split(key, 4)

    T = SEQ_LEN
    image_seq = jax.random.normal(k_img, (T, 3, IMG_HW, IMG_HW), jnp.float32)
    input_latent = jax.random.normal(k_lat, (INPUT_LATENT_DIM, T), jnp.float32)
    pre_output_latent = jax.random.normal(k_pre, (PRE_OUT, T), jnp.float32)

    params = init_params(k_par)
    kparams = prepare_params(params)

    out = mimetic_snail_critic_forward(kparams, image_seq, input_latent,
                                       pre_output_latent)
    out = jax.block_until_ready(out)
    assert out.shape == (T,), out.shape
    assert bool(jnp.all(jnp.isfinite(out)))
    print("KERNEL_OK")
</pallas_src>

<mosaic_0001>
module attributes {stable_mosaic.version = 11 : i64} {
  func.func @_fused_kernel(%arg0: memref<128x48xf32, #tpu.memory_space<vmem>>, %arg1: memref<8x128xf32, #tpu.memory_space<vmem>>, %arg2: memref<1456x128xf32, #tpu.memory_space<vmem>>, %arg3: memref<8x128xf32, #tpu.memory_space<vmem>>, %arg4: memref<8x1xf32, #tpu.memory_space<vmem>>) attributes {dimension_semantics = [], scalar_prefetch = 0 : i64, scratch_operands = 0 : i64, tpu.core_type = #tpu.core_type<tc>} {
    %c0 = arith.constant 0 : index
    %c0_0 = arith.constant 0 : index
    %0 = vector.load %arg3[%c0, %c0_0] : memref<8x128xf32, #tpu.memory_space<vmem>>, vector<8x128xf32>
    %c0_1 = arith.constant 0 : index
    %c0_2 = arith.constant 0 : index
    %1 = vector.load %arg2[%c0_1, %c0_2] : memref<1456x128xf32, #tpu.memory_space<vmem>>, vector<192x128xf32>
    %c0_3 = arith.constant 0 : index
    %c0_4 = arith.constant 0 : index
    %2 = vector.load %arg0[%c0_3, %c0_4] : memref<128x48xf32, #tpu.memory_space<vmem>>, vector<128x48xf32>
    %cst = arith.constant dense<0.000000e+00> : vector<192x48xf32>
    %3 = tpu.matmul %1, %2, %cst {dimension_numbers = #tpu.dot_dimension_numbers<[1], [0], [0], [1], [0, 0, 1, 1], [], []>} : vector<192x128xf32>, vector<128x48xf32>, vector<192x48xf32> -> vector<192x48xf32>
    %4 = vector.extract_strided_slice %3 {offsets = [0, 0], sizes = [64, 48], strides = [1, 1]} : vector<192x48xf32> to vector<64x48xf32>
    %c192 = arith.constant 192 : index
    %c0_5 = arith.constant 0 : index
    %5 = vector.load %arg2[%c192, %c0_5] : memref<1456x128xf32, #tpu.memory_space<vmem>>, vector<48x64xf32>
    %cst_6 = arith.constant dense<0.000000e+00> : vector<64x64xf32>
    %6 = tpu.matmul %4, %5, %cst_6 {dimension_numbers = #tpu.dot_dimension_numbers<[1], [0], [0], [1], [0, 0, 1, 1], [], []>} : vector<64x48xf32>, vector<48x64xf32>, vector<64x64xf32> -> vector<64x64xf32>
    %7 = vector.extract_strided_slice %3 {offsets = [64, 0], sizes = [64, 48], strides = [1, 1]} : vector<192x48xf32> to vector<64x48xf32>
    %c240 = arith.constant 240 : index
    %c0_7 = arith.constant 0 : index
    %8 = vector.load %arg2[%c240, %c0_7] : memref<1456x128xf32, #tpu.memory_space<vmem>>, vector<48x64xf32>
    %cst_8 = arith.constant dense<0.000000e+00> : vector<64x64xf32>
    %9 = tpu.matmul %7, %8, %cst_8 {dimension_numbers = #tpu.dot_dimension_numbers<[1], [0], [0], [1], [0, 0, 1, 1], [], []>} : vector<64x48xf32>, vector<48x64xf32>, vector<64x64xf32> -> vector<64x64xf32>
    %10 = vector.extract_strided_slice %3 {offsets = [128, 0], sizes = [64, 48], strides = [1, 1]} : vector<192x48xf32> to vector<64x48xf32>
    %c288 = arith.constant 288 : index
    %c0_9 = arith.constant 0 : index
    %11 = vector.load %arg2[%c288, %c0_9] : memref<1456x128xf32, #tpu.memory_space<vmem>>, vector<48x64xf32>
    %cst_10 = arith.constant dense<0.000000e+00> : vector<64x64xf32>
    %12 = tpu.matmul %10, %11, %cst_10 {dimension_numbers = #tpu.dot_dimension_numbers<[1], [0], [0], [1], [0, 0, 1, 1], [], []>} : vector<64x48xf32>, vector<48x64xf32>, vector<64x64xf32> -> vector<64x64xf32>
    %13 = arith.addf %6, %9 : vector<64x64xf32>
    %14 = vector.extract_strided_slice %0 {offsets = [0, 0], sizes = [1, 64], strides = [1, 1]} : vector<8x128xf32> to vector<1x64xf32>
    %15 = vector.broadcast %14 : vector<1x64xf32> to vector<64x64xf32>
    %16 = arith.addf %12, %15 : vector<64x64xf32>
    %17 = arith.addf %13, %16 : vector<64x64xf32>
    %cst_11 = arith.constant 0.000000e+00 : f32
    %18 = vector.broadcast %cst_11 : f32 to vector<64x64xf32>
    %19 = arith.maximumf %17, %18 : vector<64x64xf32>
    %c336 = arith.constant 336 : index
    %c0_12 = arith.constant 0 : index
    %20 = vector.load %arg2[%c336, %c0_12] : memref<1456x128xf32, #tpu.memory_space<vmem>>, vector<96x64xf32>
    %cst_13 = arith.constant dense<0.000000e+00> : vector<96x64xf32>
    %21 = tpu.matmul %20, %19, %cst_13 {dimension_numbers = #tpu.dot_dimension_numbers<[1], [0], [0], [1], [0, 0, 1, 1], [], []>} : vector<96x64xf32>, vector<64x64xf32>, vector<96x64xf32> -> vector<96x64xf32>
    %22 = vector.extract_strided_slice %21 {offsets = [0, 0], sizes = [32, 64], strides = [1, 1]} : vector<96x64xf32> to vector<32x64xf32>
    %c432 = arith.constant 432 : index
    %c0_14 = arith.constant 0 : index
    %23 = vector.load %arg2[%c432, %c0_14] : memref<1456x128xf32, #tpu.memory_space<vmem>>, vector<64x32xf32>
    %cst_15 = arith.constant dense<0.000000e+00> : vector<32x32xf32>
    %24 = tpu.matmul %22, %23, %cst_15 {dimension_numbers = #tpu.dot_dimension_numbers<[1], [0], [0], [1], [0, 0, 1, 1], [], []>} : vector<32x64xf32>, vector<64x32xf32>, vector<32x32xf32> -> vector<32x32xf32>
    %25 = vector.extract_strided_slice %21 {offsets = [32, 0], sizes = [32, 64], strides = [1, 1]} : vector<96x64xf32> to vector<32x64xf32>
    %c496 = arith.constant 496 : index
    %c0_16 = arith.constant 0 : index
    %26 = vector.load %arg2[%c496, %c0_16] : memref<1456x128xf32, #tpu.memory_space<vmem>>, vector<64x32xf32>
    %cst_17 = arith.constant dense<0.000000e+00> : vector<32x32xf32>
    %27 = tpu.matmul %25, %26, %cst_17 {dimension_numbers = #tpu.dot_dimension_numbers<[1], [0], [0], [1], [0, 0, 1, 1], [], []>} : vector<32x64xf32>, vector<64x32xf32>, vector<32x32xf32> -> vector<32x32xf32>
    %28 = vector.extract_strided_slice %21 {offsets = [64, 0], sizes = [32, 64], strides = [1, 1]} : vector<96x64xf32> to vector<32x64xf32>
    %c560 = arith.constant 560 : index
    %c0_18 = arith.constant 0 : index
    %29 = vector.load %arg2[%c560, %c0_18] : memref<1456x128xf32, #tpu.memory_space<vmem>>, vector<64x32xf32>
    %cst_19 = arith.constant dense<0.000000e+00> : vector<32x32xf32>
    %30 = tpu.matmul %28, %29, %cst_19 {dimension_numbers = #tpu.dot_dimension_numbers<[1], [0], [0], [1], [0, 0, 1, 1], [], []>} : vector<32x64xf32>, vector<64x32xf32>, vector<32x32xf32> -> vector<32x32xf32>
    %31 = arith.addf %24, %27 : vector<32x32xf32>
    %32 = vector.extract_strided_slice %0 {offsets = [1, 0], sizes = [1, 32], strides = [1, 1]} : vector<8x128xf32> to vector<1x32xf32>
    %33 = vector.broadcast %32 : vector<1x32xf32> to vector<32x32xf32>
    %34 = arith.addf %30, %33 : vector<32x32xf32>
    %35 = arith.addf %31, %34 : vector<32x32xf32>
    %cst_20 = arith.constant 0.000000e+00 : f32
    %36 = vector.broadcast %cst_20 : f32 to vector<32x32xf32>
    %37 = arith.maximumf %35, %36 : vector<32x32xf32>
    %c624 = arith.constant 624 : index
    %c0_21 = arith.constant 0 : index
    %38 = vector.load %arg2[%c624, %c0_21] : memref<1456x128xf32, #tpu.memory_space<vmem>>, vector<32x32xf32>
    %cst_22 = arith.constant dense<0.000000e+00> : vector<32x32xf32>
    %39 = tpu.matmul %38, %37, %cst_22 {dimension_numbers = #tpu.dot_dimension_numbers<[1], [0], [0], [1], [0, 0, 1, 1], [], []>} : vector<32x32xf32>, vector<32x32xf32>, vector<32x32xf32> -> vector<32x32xf32>
    %40 = vector.extract_strided_slice %39 {offsets = [0, 0], sizes = [8, 32], strides = [1, 1]} : vector<32x32xf32> to vector<8x32xf32>
    %c656 = arith.constant 656 : index
    %c0_23 = arith.constant 0 : index
    %41 = vector.load %arg2[%c656, %c0_23] : memref<1456x128xf32, #tpu.memory_space<vmem>>, vector<32x16xf32>
    %cst_24 = arith.constant dense<0.000000e+00> : vector<8x16xf32>
    %42 = tpu.matmul %40, %41, %cst_24 {dimension_numbers = #tpu.dot_dimension_numbers<[1], [0], [0], [1], [0, 0, 1, 1], [], []>} : vector<8x32xf32>, vector<32x16xf32>, vector<8x16xf32> -> vector<8x16xf32>
    %43 = vector.extract_strided_slice %39 {offsets = [8, 0], sizes = [8, 32], strides = [1, 1]} : vector<32x32xf32> to vector<8x32xf32>
    %c688 = arith.constant 688 : index
    %c0_25 = arith.constant 0 : index
    %44 = vector.load %arg2[%c688, %c0_25] : memref<1456x128xf32, #tpu.memory_space<vmem>>, vector<32x16xf32>
    %cst_26 = arith.constant dense<0.000000e+00> : vector<8x16xf32>
    %45 = tpu.matmul %43, %44, %cst_26 {dimension_numbers = #tpu.dot_dimension_numbers<[1], [0], [0], [1], [0, 0, 1, 1], [], []>} : vector<8x32xf32>, vector<32x16xf32>, vector<8x16xf32> -> vector<8x16xf32>
    %46 = vector.extract_strided_slice %39 {offsets = [16, 0], sizes = [8, 32], strides = [1, 1]} : vector<32x32xf32> to vector<8x32xf32>
    %c720 = arith.constant 720 : index
    %c0_27 = arith.constant 0 : index
    %47 = vector.load %arg2[%c720, %c0_27] : memref<1456x128xf32, #tpu.memory_space<vmem>>, vector<32x16xf32>
    %cst_28 = arith.constant dense<0.000000e+00> : vector<8x16xf32>
    %48 = tpu.matmul %46, %47, %cst_28 {dimension_numbers = #tpu.dot_dimension_numbers<[1], [0], [0], [1], [0, 0, 1, 1], [], []>} : vector<8x32xf32>, vector<32x16xf32>, vector<8x16xf32> -> vector<8x16xf32>
    %49 = vector.extract_strided_slice %39 {offsets = [24, 0], sizes = [8, 32], strides = [1, 1]} : vector<32x32xf32> to vector<8x32xf32>
    %c752 = arith.constant 752 : index
    %c0_29 = arith.constant 0 : index
    %50 = vector.load %arg2[%c752, %c0_29] : memref<1456x128xf32, #tpu.memory_space<vmem>>, vector<32x16xf32>
    %cst_30 = arith.constant dense<0.000000e+00> : vector<8x16xf32>
    %51 = tpu.matmul %49, %50, %cst_30 {dimension_numbers = #tpu.dot_dimension_numbers<[1], [0], [0], [1], [0, 0, 1, 1], [], []>} : vector<8x32xf32>, vector<32x16xf32>, vector<8x16xf32> -> vector<8x16xf32>
    %52 = arith.addf %42, %45 : vector<8x16xf32>
    %53 = arith.addf %48, %51 : vector<8x16xf32>
    %54 = arith.addf %52, %53 : vector<8x16xf32>
    %55 = vector.extract_strided_slice %0 {offsets = [2, 0], sizes = [1, 16], strides = [1, 1]} : vector<8x128xf32> to vector<1x16xf32>
    %56 = vector.broadcast %55 : vector<1x16xf32> to vector<8x16xf32>
    %57 = arith.addf %54, %56 : vector<8x16xf32>
    %c0_31 = arith.constant 0 : index
    %c0_32 = arith.constant 0 : index
    %58 = vector.load %arg1[%c0_31, %c0_32] : memref<8x128xf32, #tpu.memory_space<vmem>>, vector<8x128xf32>
    %c0_i32 = arith.constant 0 : i32
    %59 = arith.sitofp %c0_i32 : i32 to f32
    %60 = vector.broadcast %59 : f32 to vector<8x112xf32>
    %61 = tpu.concatenate %57, %60 in 1 : vector<8x16xf32>, vector<8x112xf32> -> vector<8x128xf32>
    %62 = arith.addf %58, %61 : vector<8x128xf32>
    %63 = tpu.iota {dimensions = array<i32: 0>} : vector<8x128xi32>
    %c1_i32 = arith.constant 1 : i32
    %64 = tpu.dynamic_rotate %62 by %c1_i32 dim 0 : vector<8x128xf32>, i32 -> vector<8x128xf32>
    %c1_i32_33 = arith.constant 1 : i32
    %65 = vector.broadcast %c1_i32_33 : i32 to vector<8x128xi32>
    %66 = arith.cmpi sge, %63, %65 : vector<8x128xi32>
    %cst_34 = arith.constant 0.000000e+00 : f32
    %67 = vector.broadcast %cst_34 : f32 to vector<8x128xf32>
    %68 = arith.select %66, %64, %67 : vector<8x128xi1>, vector<8x128xf32>
    %c64_i32 = arith.constant 64 : i32
    %69 = tpu.dynamic_rotate %68 by %c64_i32 dim 1 : vector<8x128xf32>, i32 -> vector<8x128xf32>
    %70 = arith.addf %62, %69 : vector<8x128xf32>
    %c784 = arith.constant 784 : index
    %c0_35 = arith.constant 0 : index
    %71 = vector.load %arg2[%c784, %c0_35] : memref<1456x128xf32, #tpu.memory_space<vmem>>, vector<128x16xf32>
    %cst_36 = arith.constant dense<0.000000e+00> : vector<8x16xf32>
    %72 = tpu.matmul %70, %71, %cst_36 {dimension_numbers = #tpu.dot_dimension_numbers<[1], [0], [0], [1], [0, 0, 1, 1], [], []>} : vector<8x128xf32>, vector<128x16xf32>, vector<8x16xf32> -> vector<8x16xf32>
    %73 = vector.extract_strided_slice %0 {offsets = [3, 0], sizes = [1, 16], strides = [1, 1]} : vector<8x128xf32> to vector<1x16xf32>
    %74 = vector.broadcast %73 : vector<1x16xf32> to vector<8x16xf32>
    %75 = arith.addf %72, %74 : vector<8x16xf32>
    %76 = vector.extract_strided_slice %75 {offsets = [0, 0], sizes = [8, 8], strides = [1, 1]} : vector<8x16xf32> to vector<8x8xf32>
    %77 = math.tanh %76 : vector<8x8xf32>
    %78 = vector.extract_strided_slice %75 {offsets = [0, 8], sizes = [8, 8], strides = [1, 1]} : vector<8x16xf32> to vector<8x8xf32>
    %79 = arith.negf %78 : vector<8x8xf32>
    %80 = math.exp %79 : vector<8x8xf32>
    %cst_37 = arith.constant 1.000000e+00 : f32
    %81 = vector.broadcast %cst_37 : f32 to vector<8x8xf32>
    %82 = arith.addf %81, %80 : vector<8x8xf32>
    %83 = arith.divf %81, %82 : vector<8x8xf32>
    %84 = arith.mulf %77, %83 : vector<8x8xf32>
    %c0_i32_38 = arith.constant 0 : i32
    %85 = arith.sitofp %c0_i32_38 : i32 to f32
    %86 = vector.broadcast %85 : f32 to vector<8x20xf32>
    %87 = tpu.concatenate %86, %84 in 1 : vector<8x20xf32>, vector<8x8xf32> -> vector<8x28xf32>
    %88 = vector.broadcast %85 : f32 to vector<8x100xf32>
    %89 = tpu.concatenate %87, %88 in 1 : vector<8x28xf32>, vector<8x100xf32> -> vector<8x128xf32>
    %90 = arith.addf %62, %89 : vector<8x128xf32>
    %c2_i32 = arith.constant 2 : i32
    %91 = tpu.dynamic_rotate %90 by %c2_i32 dim 0 : vector<8x128xf32>, i32 -> vector<8x128xf32>
    %c2_i32_39 = arith.constant 2 : i32
    %92 = vector.broadcast %c2_i32_39 : i32 to vector<8x128xi32>
    %93 = arith.cmpi sge, %63, %92 : vector<8x128xi32>
    %cst_40 = arith.constant 0.000000e+00 : f32
    %94 = vector.broadcast %cst_40 : f32 to vector<8x128xf32>
    %95 = arith.select %93, %91, %94 : vector<8x128xi1>, vector<8x128xf32>
    %c64_i32_41 = arith.constant 64 : i32
    %96 = tpu.dynamic_rotate %95 by %c64_i32_41 dim 1 : vector<8x128xf32>, i32 -> vector<8x128xf32>
    %97 = arith.addf %90, %96 : vector<8x128xf32>
    %c912 = arith.constant 912 : index
    %c0_42 = arith.constant 0 : index
    %98 = vector.load %arg2[%c912, %c0_42] : memref<1456x128xf32, #tpu.memory_space<vmem>>, vector<128x16xf32>
    %cst_43 = arith.constant dense<0.000000e+00> : vector<8x16xf32>
    %99 = tpu.matmul %97, %98, %cst_43 {dimension_numbers = #tpu.dot_dimension_numbers<[1], [0], [0], [1], [0, 0, 1, 1], [], []>} : vector<8x128xf32>, vector<128x16xf32>, vector<8x16xf32> -> vector<8x16xf32>
    %100 = vector.extract_strided_slice %0 {offsets = [4, 0], sizes = [1, 16], strides = [1, 1]} : vector<8x128xf32> to vector<1x16xf32>
    %101 = vector.broadcast %100 : vector<1x16xf32> to vector<8x16xf32>
    %102 = arith.addf %99, %101 : vector<8x16xf32>
    %103 = vector.extract_strided_slice %102 {offsets = [0, 0], sizes = [8, 8], strides = [1, 1]} : vector<8x16xf32> to vector<8x8xf32>
    %104 = math.tanh %103 : vector<8x8xf32>
    %105 = vector.extract_strided_slice %102 {offsets = [0, 8], sizes = [8, 8], strides = [1, 1]} : vector<8x16xf32> to vector<8x8xf32>
    %106 = arith.negf %105 : vector<8x8xf32>
    %107 = math.exp %106 : vector<8x8xf32>
    %cst_44 = arith.constant 1.000000e+00 : f32
    %108 = vector.broadcast %cst_44 : f32 to vector<8x8xf32>
    %109 = arith.addf %108, %107 : vector<8x8xf32>
    %110 = arith.divf %108, %109 : vector<8x8xf32>
    %111 = arith.mulf %104, %110 : vector<8x8xf32>
    %c0_i32_45 = arith.constant 0 : i32
    %112 = arith.sitofp %c0_i32_45 : i32 to f32
    %113 = vector.broadcast %112 : f32 to vector<8x28xf32>
    %114 = tpu.concatenate %113, %111 in 1 : vector<8x28xf32>, vector<8x8xf32> -> vector<8x36xf32>
    %115 = vector.broadcast %112 : f32 to vector<8x92xf32>
    %116 = tpu.concatenate %114, %115 in 1 : vector<8x36xf32>, vector<8x92xf32> -> vector<8x128xf32>
    %117 = arith.addf %90, %116 : vector<8x128xf32>
    %c4_i32 = arith.constant 4 : i32
    %118 = tpu.dynamic_rotate %117 by %c4_i32 dim 0 : vector<8x128xf32>, i32 -> vector<8x128xf32>
    %c4_i32_46 = arith.constant 4 : i32
    %119 = vector.broadcast %c4_i32_46 : i32 to vector<8x128xi32>
    %120 = arith.cmpi sge, %63, %119 : vector<8x128xi32>
    %cst_47 = arith.constant 0.000000e+00 : f32
    %121 = vector.broadcast %cst_47 : f32 to vector<8x128xf32>
    %122 = arith.select %120, %118, %121 : vector<8x128xi1>, vector<8x128xf32>
    %c64_i32_48 = arith.constant 64 : i32
    %123 = tpu.dynamic_rotate %122 by %c64_i32_48 dim 1 : vector<8x128xf32>, i32 -> vector<8x128xf32>
    %124 = arith.addf %117, %123 : vector<8x128xf32>
    %c1040 = arith.constant 1040 : index
    %c0_49 = arith.constant 0 : index
    %125 = vector.load %arg2[%c1040, %c0_49] : memref<1456x128xf32, #tpu.memory_space<vmem>>, vector<128x16xf32>
    %cst_50 = arith.constant dense<0.000000e+00> : vector<8x16xf32>
    %126 = tpu.matmul %124, %125, %cst_50 {dimension_numbers = #tpu.dot_dimension_numbers<[1], [0], [0], [1], [0, 0, 1, 1], [], []>} : vector<8x128xf32>, vector<128x16xf32>, vector<8x16xf32> -> vector<8x16xf32>
    %127 = vector.extract_strided_slice %0 {offsets = [5, 0], sizes = [1, 16], strides = [1, 1]} : vector<8x128xf32> to vector<1x16xf32>
    %128 = vector.broadcast %127 : vector<1x16xf32> to vector<8x16xf32>
    %129 = arith.addf %126, %128 : vector<8x16xf32>
    %130 = vector.extract_strided_slice %129 {offsets = [0, 0], sizes = [8, 8], strides = [1, 1]} : vector<8x16xf32> to vector<8x8xf32>
    %131 = math.tanh %130 : vector<8x8xf32>
    %132 = vector.extract_strided_slice %129 {offsets = [0, 8], sizes = [8, 8], strides = [1, 1]} : vector<8x16xf32> to vector<8x8xf32>
    %133 = arith.negf %132 : vector<8x8xf32>
    %134 = math.exp %133 : vector<8x8xf32>
    %cst_51 = arith.constant 1.000000e+00 : f32
    %135 = vector.broadcast %cst_51 : f32 to vector<8x8xf32>
    %136 = arith.addf %135, %134 : vector<8x8xf32>
    %137 = arith.divf %135, %136 : vector<8x8xf32>
    %138 = arith.mulf %131, %137 : vector<8x8xf32>
    %c0_i32_52 = arith.constant 0 : i32
    %139 = arith.sitofp %c0_i32_52 : i32 to f32
    %140 = vector.broadcast %139 : f32 to vector<8x36xf32>
    %141 = tpu.concatenate %140, %138 in 1 : vector<8x36xf32>, vector<8x8xf32> -> vector<8x44xf32>
    %142 = vector.broadcast %139 : f32 to vector<8x84xf32>
    %143 = tpu.concatenate %141, %142 in 1 : vector<8x44xf32>, vector<8x84xf32> -> vector<8x128xf32>
    %144 = arith.addf %117, %143 : vector<8x128xf32>
    %c1168 = arith.constant 1168 : index
    %c0_53 = arith.constant 0 : index
    %145 = vector.load %arg2[%c1168, %c0_53] : memref<1456x128xf32, #tpu.memory_space<vmem>>, vector<128x24xf32>
    %cst_54 = arith.constant dense<0.000000e+00> : vector<8x24xf32>
    %146 = tpu.matmul %144, %145, %cst_54 {dimension_numbers = #tpu.dot_dimension_numbers<[1], [0], [0], [1], [0, 0, 1, 1], [], []>} : vector<8x128xf32>, vector<128x24xf32>, vector<8x24xf32> -> vector<8x24xf32>
    %147 = vector.extract_strided_slice %0 {offsets = [6, 0], sizes = [1, 24], strides = [1, 1]} : vector<8x128xf32> to vector<1x24xf32>
    %148 = vector.broadcast %147 : vector<1x24xf32> to vector<8x24xf32>
    %149 = arith.addf %146, %148 : vector<8x24xf32>
    %150 = vector.extract_strided_slice %149 {offsets = [0, 0], sizes = [8, 8], strides = [1, 1]} : vector<8x24xf32> to vector<8x8xf32>
    %151 = vector.extract_strided_slice %149 {offsets = [0, 8], sizes = [8, 8], strides = [1, 1]} : vector<8x24xf32> to vector<8x8xf32>
    %152 = vector.extract_strided_slice %149 {offsets = [0, 16], sizes = [8, 8], strides = [1, 1]} : vector<8x24xf32> to vector<8x8xf32>
    %cst_55 = arith.constant dense<0.000000e+00> : vector<8x8xf32>
    %153 = tpu.matmul %150, %151, %cst_55 {dimension_numbers = #tpu.dot_dimension_numbers<[1], [1], [0], [0], [0, 0, 1, 0], [], []>} : vector<8x8xf32>, vector<8x8xf32>, vector<8x8xf32> -> vector<8x8xf32>
    %cst_56 = arith.constant 0.353553385 : f32
    %154 = vector.broadcast %cst_56 : f32 to vector<8x8xf32>
    %155 = arith.mulf %153, %154 : vector<8x8xf32>
    %156 = tpu.iota {dimensions = array<i32: 0>} : vector<8x8xi32>
    %157 = tpu.iota {dimensions = array<i32: 1>} : vector<8x8xi32>
    %158 = arith.cmpi sle, %157, %156 : vector<8x8xi32>
    %cst_57 = arith.constant -1.000000e+30 : f32
    %159 = vector.broadcast %cst_57 : f32 to vector<8x8xf32>
    %160 = arith.select %158, %155, %159 : vector<8x8xi1>, vector<8x8xf32>
    %cst_58 = arith.constant dense<0xFF800000> : vector<8xf32>
    %161 = vector.multi_reduction <maximumf>, %160, %cst_58 [1] : vector<8x8xf32> to vector<8xf32>
    %162 = vector.shape_cast %161 : vector<8xf32> to vector<8x1xf32>
    %163 = vector.broadcast %162 : vector<8x1xf32> to vector<8x8xf32>
    %164 = arith.subf %160, %163 : vector<8x8xf32>
    %165 = math.exp %164 : vector<8x8xf32>
    %cst_59 = arith.constant dense<0.000000e+00> : vector<8xf32>
    %166 = vector.multi_reduction <add>, %165, %cst_59 [1] : vector<8x8xf32> to vector<8xf32>
    %167 = vector.shape_cast %166 : vector<8xf32> to vector<8x1xf32>
    %168 = tpu.reciprocal %167 {approx = true} : vector<8x1xf32> -> vector<8x1xf32>
    %169 = vector.broadcast %168 : vector<8x1xf32> to vector<8x8xf32>
    %170 = arith.mulf %165, %169 : vector<8x8xf32>
    %cst_60 = arith.constant dense<0.000000e+00> : vector<8x8xf32>
    %171 = tpu.matmul %170, %152, %cst_60 {dimension_numbers = #tpu.dot_dimension_numbers<[1], [0], [0], [1], [0, 0, 1, 1], [], []>} : vector<8x8xf32>, vector<8x8xf32>, vector<8x8xf32> -> vector<8x8xf32>
    %c0_i32_61 = arith.constant 0 : i32
    %172 = arith.sitofp %c0_i32_61 : i32 to f32
    %173 = vector.broadcast %172 : f32 to vector<8x44xf32>
    %174 = tpu.concatenate %173, %171 in 1 : vector<8x44xf32>, vector<8x8xf32> -> vector<8x52xf32>
    %175 = vector.broadcast %172 : f32 to vector<8x76xf32>
    %176 = tpu.concatenate %174, %175 in 1 : vector<8x52xf32>, vector<8x76xf32> -> vector<8x128xf32>
    %177 = arith.addf %144, %176 : vector<8x128xf32>
    %c1296 = arith.constant 1296 : index
    %c0_62 = arith.constant 0 : index
    %178 = vector.load %arg2[%c1296, %c0_62] : memref<1456x128xf32, #tpu.memory_space<vmem>>, vector<128x32xf32>
    %cst_63 = arith.constant dense<0.000000e+00> : vector<8x32xf32>
    %179 = tpu.matmul %177, %178, %cst_63 {dimension_numbers = #tpu.dot_dimension_numbers<[1], [0], [0], [1], [0, 0, 1, 1], [], []>} : vector<8x128xf32>, vector<128x32xf32>, vector<8x32xf32> -> vector<8x32xf32>
    %180 = vector.extract_strided_slice %0 {offsets = [7, 0], sizes = [1, 32], strides = [1, 1]} : vector<8x128xf32> to vector<1x32xf32>
    %181 = vector.broadcast %180 : vector<1x32xf32> to vector<8x32xf32>
    %182 = arith.addf %179, %181 : vector<8x32xf32>
    %cst_64 = arith.constant 0.000000e+00 : f32
    %183 = vector.broadcast %cst_64 : f32 to vector<8x32xf32>
    %184 = arith.maximumf %182, %183 : vector<8x32xf32>
    %c1424 = arith.constant 1424 : index
    %c0_65 = arith.constant 0 : index
    %185 = vector.load %arg2[%c1424, %c0_65] : memref<1456x128xf32, #tpu.memory_space<vmem>>, vector<32x1xf32>
    %cst_66 = arith.constant dense<0.000000e+00> : vector<8x1xf32>
    %186 = tpu.matmul %184, %185, %cst_66 {dimension_numbers = #tpu.dot_dimension_numbers<[1], [0], [0], [1], [0, 0, 1, 1], [], []>} : vector<8x32xf32>, vector<32x1xf32>, vector<8x1xf32> -> vector<8x1xf32>
    %187 = vector.extract_strided_slice %0 {offsets = [7, 32], sizes = [1, 1], strides = [1, 1]} : vector<8x128xf32> to vector<1x1xf32>
    %188 = vector.broadcast %187 : vector<1x1xf32> to vector<8x1xf32>
    %189 = arith.addf %186, %188 : vector<8x1xf32>
    %c0_67 = arith.constant 0 : index
    %c0_68 = arith.constant 0 : index
    %190 = vector.load %arg4[%c0_67, %c0_68] : memref<8x1xf32, #tpu.memory_space<vmem>>, vector<8x1xf32>
    tpu.vector_store %arg4[%c0_67, %c0_68], %189 {strides = array<i32>} : memref<8x1xf32, #tpu.memory_space<vmem>>, vector<8x1xf32>,
    return
  }
}

</mosaic_0001>

<bundles_post_ra>
// kernel: mimetic_snail_critic_forward.1
= control target key start
LH: loop header
LB: loop body
LE: loop exit
PB: predicated region body
PF: predicated region fallthrough
CT: control target
= control target key end

     0   :  { %vm255_vm0 = vcmask 392192   ;;  %vm681_vm1 = vcmask 523264   ;;  %vm1174_vm2 = vcmask 261120   ;;  %vm3565_vm3 = vmmov 0   ;;  %s3567_s10 = smov 64   ;;  %s3569_s23 = smov 20   ;;  %s4401_s0 = inlined_call_operand.vmem [shape: f32[128,48], index: 0, kind: input, shape index: {}]   ;;  %s4402_s2 = inlined_call_operand.vmem [shape: f32[1456,128], index: 2, kind: input, shape index: {}]   ;;  %s4403_s3 = inlined_call_operand.vmem [shape: f32[8,128], index: 3, kind: input, shape index: {}]   ;;  %s4404_s1 = inlined_call_operand.vmem [shape: f32[8,128], index: 1, kind: input, shape index: {}]   ;;  %s4405_s4 = inlined_call_operand.vmem [shape: f32[8,1], index: 4, kind: output, shape index: {}]  }
   0x1   :  { %v42_v0 = vld [vmem:[%s4401_s0] sm:$0xff]  ;;  %v43_v1 = vld [vmem:[%s4401_s0 + $0x8] sm:$0xff]  ;;  %v44_v2 = vld [vmem:[%s4401_s0 + $0x10] sm:$0xff]  ;;  %vm1587_vm4 = vcmask 130048   ;;  %vm1704_vm6 = vcmask 162816   ;;  %vm1706_vm7 = vcmask 228352  }
   0x2   :  { %v3204_v3 = vpack.c.bf16 %v43_v1, %v42_v0  ;;  %v45_v4 = vld [vmem:[%s4401_s0 + $0x18] sm:$0xff]  ;;  %v46_v6 = vld [vmem:[%s4401_s0 + $0x20] sm:$0xff]  ;;  %v47_v7 = vld [vmem:[%s4401_s0 + $0x28] sm:$0xff]  ;;  %s3570_s29 = smov 28   ;;  %vm1822_vm9 = vcmask 293888   ;;  %vm1938_vm11 = vcmask 359424  }
   0x3   :  { %v3208_v5 = vpack.c.bf16 %v45_v4, %v44_v2  ;;  %v3212_v8 = vpack.c.bf16 %v47_v7, %v46_v6  ;;  %v18_v9 = vld [vmem:[%s4402_s2] sm:$0xff]  ;;  %v48_v10 = vld [vmem:[%s4401_s0 + $0x30] sm:$0xff]  ;;  %v49_v11 = vld [vmem:[%s4401_s0 + $0x38] sm:$0xff]  ;;  %vm2034_vm12 = vcmask 64512   ;;  %s3573_s12 = smov 44   ;;  %vm2206_vm14 = vcmask 424960  }
   0x4   :  { %3205 = vmatprep.subr.bf16.mxu0 %v3204_v3  ;;  %2742 = vmatprep.mubr.f32.mxu0 %v18_v9  ;;  %v3216_v12 = vpack.c.bf16 %v49_v11, %v48_v10  ;;  %v50_v13 = vld [vmem:[%s4401_s0 + $0x40] sm:$0xff]  ;;  %v51_v14 = vld [vmem:[%s4401_s0 + $0x48] sm:$0xff]  ;;  %v52_v16 = vld [vmem:[%s4401_s0 + $0x50] sm:$0xff]  ;;  %s3574_s19 = smov 96   ;;  %vm2381_vm15 = vcmask 7168  }
   0x5   :  { %3207 = vmatpush3.bf16.msra.mxu0 %v3204_v3  ;;  %v3220_v15 = vpack.c.bf16 %v51_v14, %v50_v13  ;;  %v53_v17 = vld [vmem:[%s4401_s0 + $0x58] sm:$0xff]  ;;  %v54_v19 = vld [vmem:[%s4401_s0 + $0x60] sm:$0xff]  ;;  %v55_v20 = vld [vmem:[%s4401_s0 + $0x68] sm:$0xff] }
   0x6   :  { %3209 = vmatprep.subr.bf16.mxu0 %v3208_v5  ;;  %v3224_v18 = vpack.c.bf16 %v53_v17, %v52_v16  ;;  %v3228_v21 = vpack.c.bf16 %v55_v20, %v54_v19  ;;  %v56_v22 = vld [vmem:[%s4401_s0 + $0x70] sm:$0xff]  ;;  %v57_v23 = vld [vmem:[%s4401_s0 + $0x78] sm:$0xff]  ;;  %v19_v25 = vld [vmem:[%s4402_s2 + $0x8] sm:$0xff]  ;;  %s3571_s0 = smov 36  }
   0x7   :  { %v3232_v24 = vpack.c.bf16 %v57_v23, %v56_v22  ;;  %v20_v26 = vld [vmem:[%s4402_s2 + $0x10] sm:$0xff]  ;;  %v21_v27 = vld [vmem:[%s4402_s2 + $0x18] sm:$0xff]  ;;  %v22_v28 = vld [vmem:[%s4402_s2 + $0x20] sm:$0xff] }
   0x8   :  { %v23_v29 = vld [vmem:[%s4402_s2 + $0x28] sm:$0xff]  ;;  %v24_v30 = vld [vmem:[%s4402_s2 + $0x30] sm:$0xff]  ;;  %v25_v31 = vld [vmem:[%s4402_s2 + $0x38] sm:$0xff] }
   0x9   :  { %3211 = vmatpush3.bf16.msra.mxu0 %v3208_v5  ;;  %v26_v32 = vld [vmem:[%s4402_s2 + $0x40] sm:$0xff]  ;;  %v27_v33 = vld [vmem:[%s4402_s2 + $0x48] sm:$0xff]  ;;  %v28_v34 = vld [vmem:[%s4402_s2 + $0x50] sm:$0xff] }
   0xa   :  { %3213 = vmatprep.subr.bf16.mxu0 %v3212_v8  ;;  %v29_v35 = vld [vmem:[%s4402_s2 + $0x58] sm:$0xff]  ;;  %v30_v36 = vld [vmem:[%s4402_s2 + $0x60] sm:$0xff]  ;;  %v31_v37 = vld [vmem:[%s4402_s2 + $0x68] sm:$0xff] }
   0xb   :  { %v32_v38 = vld [vmem:[%s4402_s2 + $0x70] sm:$0xff]  ;;  %v33_v39 = vld [vmem:[%s4402_s2 + $0x78] sm:$0xff]  ;;  %v34_v40 = vld [vmem:[%s4402_s2 + $0x80] sm:$0xff] }
   0xc   :  { %v35_v41 = vld [vmem:[%s4402_s2 + $0x88] sm:$0xff]  ;;  %v36_v42 = vld [vmem:[%s4402_s2 + $0x90] sm:$0xff]  ;;  %v37_v43 = vld [vmem:[%s4402_s2 + $0x98] sm:$0xff] }
   0xd   :  { %3215 = vmatpush3.bf16.msra.mxu0 %v3212_v8  ;;  %v38_v44 = vld [vmem:[%s4402_s2 + $0xa0] sm:$0xff]  ;;  %v39_v45 = vld [vmem:[%s4402_s2 + $0xa8] sm:$0xff]  ;;  %v40_v46 = vld [vmem:[%s4402_s2 + $0xb0] sm:$0xff] }
   0xe   :  { %3217 = vmatprep.subr.bf16.mxu0 %v3216_v12  ;;  %v41_v47 = vld [vmem:[%s4402_s2 + $0xb8] sm:$0xff]  ;;  %v249_v48 = vld [vmem:[%s4402_s2 + $0xf0] sm:$0xff]  ;;  %v251_v51 = vld [vmem:[%s4402_s2 + $0x100] sm:$0xff] }
   0xf   :  { %v250_v49 = vld [vmem:[%s4402_s2 + $0xf8] sm:$0xff]  ;;  %v252_v52 = vld [vmem:[%s4402_s2 + $0x108] sm:$0xff]  ;;  %v253_v54 = vld [vmem:[%s4402_s2 + $0x110] sm:$0xff] }
  0x10   :  { %v3236_v50 = vpack.c.bf16 %v250_v49, %v249_v48  ;;  %v3240_v53 = vpack.c.bf16 %v252_v52, %v251_v51  ;;  %v254_v55 = vld [vmem:[%s4402_s2 + $0x118] sm:$0xff]  ;;  %v243_v57 = vld [vmem:[%s4402_s2 + $0xc0] sm:$0xff]  ;;  %v244_v58 = vld [vmem:[%s4402_s2 + $0xc8] sm:$0xff]  ;;  %v520_v48 = vlaneseq }
  0x11   :  { %3219 = vmatpush3.bf16.msra.mxu0 %v3216_v12  ;;  %v3244_v56 = vpack.c.bf16 %v254_v55, %v253_v54  ;;  %v3248_v59 = vpack.c.bf16 %v244_v58, %v243_v57  ;;  %v245_v4 = vld [vmem:[%s4402_s2 + $0xd0] sm:$0xff]  ;;  %v246_v5 = vld [vmem:[%s4402_s2 + $0xd8] sm:$0xff]  ;;  %v247_v9 = vld [vmem:[%s4402_s2 + $0xe0] sm:$0xff] }
  0x12   :  { %3221 = vmatprep.subr.bf16.mxu0 %v3220_v15  ;;  %3237 = vmatprep.subr.bf16.mxu1 %v3236_v50  ;;  %v3252_v8 = vpack.c.bf16 %v246_v5, %v245_v4  ;;  %v248_v10 = vld [vmem:[%s4402_s2 + $0xe8] sm:$0xff]  ;;  %v385_v14 = vld [vmem:[%s4402_s2 + $0x120] sm:$0xff]  ;;  %v388_v22 = vld [vmem:[%s4402_s2 + $0x138] sm:$0xff]  ;;  %v3827_v49 = vshrl.u32 %v520_v48, 7 }
  0x13   :  { %3239 = vmatpush3.bf16.msra.mxu1 %v3236_v50  ;;  %v3256_v13 = vpack.c.bf16 %v248_v10, %v247_v9  ;;  %v3833_v51 = vld [vmem:[%s4403_s3] sm:$0xff] }
  0x14   :  { %3241 = vmatprep.subr.bf16.mxu1 %v3240_v53  ;;  %v522_v50 = vsub.s32 0, %v3827_v49  ;;  %vm1593_vm5 = vcmp.ge.s32.totalorder %v3827_v49, 1  ;;  %vm1710_vm8 = vcmp.ge.s32.totalorder %v3827_v49, 2  ;;  %vm1826_vm10 = vcmp.ge.s32.totalorder %v3827_v49, 4 }
  0x15   :  { %3223 = vmatpush3.bf16.msra.mxu0 %v3220_v15  ;;  %v386_v15 = vld [vmem:[%s4402_s2 + $0x128] sm:$0xff] }
  0x16   :  { %3225 = vmatprep.subr.bf16.mxu0 %v3224_v18  ;;  %v523_v52 = vrot.slane %v3833_v51, %v522_v50 }
  0x17   :  { %3243 = vmatpush3.bf16.msra.mxu1 %v3240_v53 }
  0x18   :  { %3245 = vmatprep.subr.bf16.mxu1 %v3244_v56 }
  0x19   :  { %3227 = vmatpush3.bf16.msra.mxu0 %v3224_v18  ;;  %v3260_v18 = vpack.c.bf16 %v386_v15, %v385_v14 }
  0x1a   :  { %3229 = vmatprep.subr.bf16.mxu0 %v3228_v21 }
  0x1b   :  { %3247 = vmatpush3.bf16.msra.mxu1 %v3244_v56 }
  0x1c   :  { %3249 = vmatprep.subr.bf16.mxu1 %v3248_v59 }
  0x1d   :  { %3231 = vmatpush3.bf16.msra.mxu0 %v3228_v21  ;;  %v387_v21 = vld [vmem:[%s4402_s2 + $0x130] sm:$0xff] }
  0x1e   :  { %3233 = vmatprep.subr.bf16.mxu0 %v3232_v24 }
  0x21   :  { %3235 = vmatpush3.bf16.msra.mxu0 %v3232_v24  ;;  %v3264_v24 = vpack.c.bf16 %v388_v22, %v387_v21  ;;  %v674_v21 = vld [vmem:[%s4402_s2 + $0x178] sm:$0xff]  ;;  %v675_v22 = vld [vmem:[%s4402_s2 + $0x180] sm:$0xff] }
  0x24   :  { %2743 = vmatmul.mubr.f32.vlgmr.msra.gmra.mrb[0].mxu0 %v19_v25 }
  0x25   :  { %2745 = vmatprep.mubr.f32.mxu0 %v20_v26  ;;  %v389_v26 = vld [vmem:[%s4402_s2 + $0x140] sm:$0xff] }
  0x28   :  { %2746 = vmatmul.mubr.f32.gmra.mrb[2].mxu0 %v21_v27  ;;  %v390_v27 = vld [vmem:[%s4402_s2 + $0x148] sm:$0xff] }
  0x29   :  { %2748 = vmatprep.mubr.f32.mxu0 %v22_v28 }
  0x2c   :  { %2749 = vmatmul.mubr.f32.gmra.mrb[4].mxu0 %v23_v29  ;;  %v3268_v29 = vpack.c.bf16 %v390_v27, %v389_v26  ;;  %v679_v26 = vld [vmem:[%s4402_s2 + $0x1a0] sm:$0xff]  ;;  %v680_v27 = vld [vmem:[%s4402_s2 + $0x1a8] sm:$0xff] }
  0x2d   :  { %2751 = vmatprep.mubr.f32.mxu0 %v24_v30 }
  0x30   :  { %2752 = vmatmul.mubr.f32.gmra.mrb[6].mxu0 %v25_v31 }
  0x31   :  { %2754 = vmatprep.mubr.f32.mxu0 %v26_v32 }
  0x34   :  { %2755 = vmatmul.mubr.f32.gmra.mrb[8].mxu0 %v27_v33 }
  0x35   :  { %2757 = vmatprep.mubr.f32.mxu0 %v28_v34 }
  0x38   :  { %2758 = vmatmul.mubr.f32.gmra.mrb[10].mxu0 %v29_v35  ;;  %v669_v35 = vld [vmem:[%s4402_s2 + $0x150] sm:$0xff] }
  0x39   :  { %2760 = vmatprep.mubr.f32.mxu0 %v30_v36  ;;  %v851_v36 = vld [vmem:[%s4402_s2 + $0x1f0] sm:$0xff] }
  0x3c   :  { %2761 = vmatmul.mubr.f32.gmra.mrb[12].mxu0 %v31_v37  ;;  %v852_v37 = vld [vmem:[%s4402_s2 + $0x1f8] sm:$0xff] }
  0x3d   :  { %2763 = vmatprep.mubr.f32.mxu0 %v32_v38  ;;  %v853_v38 = vld [vmem:[%s4402_s2 + $0x200] sm:$0xff] }
  0x40   :  { %2764 = vmatmul.mubr.f32.gmra.mrb[14].mxu0 %v33_v39  ;;  %v3288_v39 = vpack.c.bf16 %v852_v37, %v851_v36  ;;  %v846_v36 = vld [vmem:[%s4402_s2 + $0x1c8] sm:$0xff] }
  0x41   :  { %2766 = vmatprep.mubr.f32.mxu0 %v34_v40  ;;  %v854_v40 = vld [vmem:[%s4402_s2 + $0x208] sm:$0xff] }
  0x42   :  { %3289 = vmatprep.subr.bf16.mxu0 %v3288_v39 }
  0x43   :  { %3291 = vmatpush3.bf16.msra.mxu0 %v3288_v39 }
  0x44   :  { %2767 = vmatmul.mubr.f32.gmra.mrb[16].mxu0 %v35_v41  ;;  %v3292_v41 = vpack.c.bf16 %v854_v40, %v853_v38  ;;  %v847_v40 = vld [vmem:[%s4402_s2 + $0x1d0] sm:$0xff] }
  0x45   :  { %2769 = vmatprep.mubr.f32.mxu0 %v36_v42  ;;  %v855_v42 = vld [vmem:[%s4402_s2 + $0x210] sm:$0xff] }
  0x46   :  { %3293 = vmatprep.subr.bf16.mxu0 %v3292_v41 }
  0x47   :  { %3295 = vmatpush3.bf16.msra.mxu0 %v3292_v41  ;;  %v848_v41 = vld [vmem:[%s4402_s2 + $0x1d8] sm:$0xff] }
  0x48   :  { %2770 = vmatmul.mubr.f32.gmra.mrb[18].mxu0 %v37_v43  ;;  %v856_v43 = vld [vmem:[%s4402_s2 + $0x218] sm:$0xff] }
  0x49   :  { %2772 = vmatprep.mubr.f32.mxu0 %v38_v44  ;;  %v3296_v44 = vpack.c.bf16 %v856_v43, %v855_v42 }
  0x4b   :  { %3297 = vmatprep.subr.bf16.mxu0 %v3296_v44 }
  0x4c   :  { %2773 = vmatmul.mubr.f32.gmra.mrb[20].mxu0 %v39_v45  ;;  %v857_v45 = vld [vmem:[%s4402_s2 + $0x220] sm:$0xff] }
  0x4d   :  { %2775 = vmatprep.mubr.f32.mxu0 %v40_v46  ;;  %v858_v46 = vld [vmem:[%s4402_s2 + $0x228] sm:$0xff]  ;;  %3299 = vmatpush3.bf16.msra.mxu0 %v3296_v44  ;;  %v3312_v44 = vpack.c.bf16 %v848_v41, %v847_v40  ;;  %v1273_v40 = vld [vmem:[%s4402_s2 + $0x298] sm:$0xff] }
  0x50   :  { %2776 = vmatmul.mubr.f32.gmra.mrb[22].mxu0 %v41_v47  ;;  %v3300_v47 = vpack.c.bf16 %v858_v46, %v857_v45  ;;  %v849_v45 = vld [vmem:[%s4402_s2 + $0x1e0] sm:$0xff]  ;;  %v850_v46 = vld [vmem:[%s4402_s2 + $0x1e8] sm:$0xff] }
  0x51   :  { %v3316_v50 = vpack.c.bf16 %v850_v46, %v849_v45  ;;  %v1275_v45 = vld [vmem:[%s4402_s2 + $0x2a8] sm:$0xff] }
  0x52   :  { %3301 = vmatprep.subr.bf16.mxu0 %v3300_v47 }
  0x53   :  { %3303 = vmatpush3.bf16.msra.mxu0 %v3300_v47 }
  0xf7   :  { %v2744_v60 = vpop.f32.mrb[0].mxu0 }
  0xf8   :  { %v124_v61 = vpop.f32.mrb[1].mxu0 }
  0xfb   :  { %v2747_v62 = vpop.f32.mrb[2].mxu0 }
  0xfc   :  { %v134_v63 = vpop.f32.mrb[3].mxu0 }
  0xff   :  { %v2750_v0 = vpop.f32.mrb[4].mxu0 }
 0x100   :  { %v144_v1 = vpop.f32.mrb[5].mxu0 }
 0x103   :  { %v2753_v2 = vpop.f32.mrb[6].mxu0 }
 0x104   :  { %v154_v3 = vpop.f32.mrb[7].mxu0 }
 0x107   :  { %v2756_v6 = vpop.f32.mrb[8].mxu0 }
 0x108   :  { %v164_v7 = vpop.f32.mrb[9].mxu0 }
 0x109   :  { %2790 = vmatprep.mubr.msk.f32.mxu1 %vm255_vm0, %v164_v7 }
 0x10a   :  { %2791 = vmatmul.mubr.msk.f32.vlgmr.msra.gmra.mrb[0].mxu1 %vm255_vm0, %v2756_v6 }
 0x10b   :  { %v2759_v11 = vpop.f32.mrb[10].mxu0  ;;  %3251 = vmatpush3.bf16.msra.mxu1 %v3248_v59 }
 0x10c   :  { %v174_v12 = vpop.f32.mrb[11].mxu0  ;;  %3253 = vmatprep.subr.bf16.mxu1 %v3252_v8 }
 0x10d   :  { %2793 = vmatprep.mubr.msk.f32.mxu1 %vm255_vm0, %v174_v12 }
 0x10e   :  { %2794 = vmatmul.mubr.msk.f32.gmra.mrb[2].mxu1 %vm255_vm0, %v2759_v11 }
 0x10f   :  { %v2762_v16 = vpop.f32.mrb[12].mxu0  ;;  %3255 = vmatpush3.bf16.msra.mxu1 %v3252_v8 }
 0x110   :  { %v184_v17 = vpop.f32.mrb[13].mxu0  ;;  %3257 = vmatprep.subr.bf16.mxu1 %v3256_v13 }
 0x111   :  { %2796 = vmatprep.mubr.msk.f32.mxu1 %vm255_vm0, %v184_v17  ;;  %v670_v17 = vld [vmem:[%s4402_s2 + $0x158] sm:$0xff] }
 0x112   :  { %2797 = vmatmul.mubr.msk.f32.gmra.mrb[4].mxu1 %vm255_vm0, %v2762_v16 }
 0x113   :  { %v2765_v19 = vpop.f32.mrb[14].mxu0  ;;  %3259 = vmatpush3.bf16.msra.mxu1 %v3256_v13 }
 0x114   :  { %v194_v20 = vpop.f32.mrb[15].mxu0  ;;  %3261 = vmatprep.subr.bf16.mxu1 %v3260_v18 }
 0x115   :  { %2799 = vmatprep.mubr.msk.f32.mxu1 %vm255_vm0, %v194_v20  ;;  %v673_v20 = vld [vmem:[%s4402_s2 + $0x170] sm:$0xff] }
 0x116   :  { %2800 = vmatmul.mubr.msk.f32.gmra.mrb[6].mxu1 %vm255_vm0, %v2765_v19  ;;  %v672_v19 = vld [vmem:[%s4402_s2 + $0x168] sm:$0xff] }
 0x117   :  { %2814 = vmatprep.mubr.msk.f32.mxu1 %vm255_vm0, %v124_v61  ;;  %v2768_v23 = vpop.f32.mrb[16].mxu0 }
 0x118   :  { %v204_v25 = vpop.f32.mrb[17].mxu0 }
 0x11a   :  { %2815 = vmatmul.mubr.msk.f32.vlgmr.msra.gmra.mrb[0].mxu1 %vm255_vm0, %v2744_v60 }
 0x11b   :  { %2817 = vmatprep.mubr.msk.f32.mxu1 %vm255_vm0, %v134_v63  ;;  %3263 = vmatpush3.bf16.msra.mxu1 %v3260_v18  ;;  %v2771_v28 = vpop.f32.mrb[18].mxu0  ;;  %v671_v18 = vld [vmem:[%s4402_s2 + $0x160] sm:$0xff] }
 0x11c   :  { %3265 = vmatprep.subr.bf16.mxu1 %v3264_v24  ;;  %v214_v30 = vpop.f32.mrb[19].mxu0 }
 0x11e   :  { %2818 = vmatmul.mubr.msk.f32.gmra.mrb[2].mxu1 %vm255_vm0, %v2747_v62 }
 0x11f   :  { %2820 = vmatprep.mubr.msk.f32.mxu1 %vm255_vm0, %v144_v1  ;;  %3267 = vmatpush3.bf16.msra.mxu1 %v3264_v24  ;;  %v2774_v31 = vpop.f32.mrb[20].mxu0  ;;  %v677_v24 = vld [vmem:[%s4402_s2 + $0x190] sm:$0xff] }
 0x120   :  { %3269 = vmatprep.subr.bf16.mxu1 %v3268_v29  ;;  %v224_v32 = vpop.f32.mrb[21].mxu0 }
 0x122   :  { %2821 = vmatmul.mubr.msk.f32.gmra.mrb[4].mxu1 %vm255_vm0, %v2750_v0 }
 0x123   :  { %2823 = vmatprep.mubr.msk.f32.mxu1 %vm255_vm0, %v154_v3  ;;  %3271 = vmatpush3.bf16.msra.mxu1 %v3268_v29  ;;  %v2777_v33 = vpop.f32.mrb[22].mxu0  ;;  %v844_v29 = vld [vmem:[%s4402_s2 + $0x1b8] sm:$0xff] }
 0x124   :  { %v234_v34 = vpop.f32.mrb[23].mxu0 }
 0x126   :  { %2824 = vmatmul.mubr.msk.f32.gmra.mrb[6].mxu1 %vm255_vm0, %v2753_v2 }
 0x127   :  { %2838 = vmatprep.mubr.msk.f32.mxu1 %vm255_vm0, %v204_v25  ;;  %v678_v25 = vld [vmem:[%s4402_s2 + $0x198] sm:$0xff] }
 0x12a   :  { %2839 = vmatmul.mubr.msk.f32.vlgmr.msra.gmra.mrb[0].mxu1 %vm255_vm0, %v2768_v23  ;;  %v676_v23 = vld [vmem:[%s4402_s2 + $0x188] sm:$0xff] }
 0x12b   :  { %2841 = vmatprep.mubr.msk.f32.mxu1 %vm255_vm0, %v214_v30 }
 0x12e   :  { %2842 = vmatmul.mubr.msk.f32.gmra.mrb[2].mxu1 %vm255_vm0, %v2771_v28  ;;  %v843_v28 = vld [vmem:[%s4402_s2 + $0x1b0] sm:$0xff] }
 0x12f   :  { %2844 = vmatprep.mubr.msk.f32.mxu1 %vm255_vm0, %v224_v32  ;;  %v3304_v30 = vpack.c.bf16 %v844_v29, %v843_v28  ;;  %v1172_v28 = vld [vmem:[%s4402_s2 + $0x280] sm:$0xff]  ;;  %v1173_v29 = vld [vmem:[%s4402_s2 + $0x288] sm:$0xff] }
 0x131   :  { %3305 = vmatprep.subr.bf16.mxu0 %v3304_v30 }
 0x132   :  { %2845 = vmatmul.mubr.msk.f32.gmra.mrb[4].mxu1 %vm255_vm0, %v2774_v31 }
 0x133   :  { %2847 = vmatprep.mubr.msk.f32.mxu1 %vm255_vm0, %v234_v34 }
 0x136   :  { %2848 = vmatmul.mubr.msk.f32.gmra.mrb[6].mxu1 %vm255_vm0, %v2777_v33 }
 0x137   :  { %2866 = vmatprep.mubr.msk.f32.mxu1 %vm681_vm1, %v669_v35  ;;  %v845_v35 = vld [vmem:[%s4402_s2 + $0x1c0] sm:$0xff] }
 0x138   :  { %v3308_v39 = vpack.c.bf16 %v846_v36, %v845_v35  ;;  %v1360_v35 = vld [vmem:[%s4402_s2 + $0x308] sm:$0xff] }
 0x1fd   :  { %v2840_v53 = vpop.f32.mrb[0].mxu1 }
 0x1fe   :  { %v620_v54 = vadd.f32 %v2840_v53, %v523_v52  ;;  %v614_v55 = vpop.f32.mrb[1].mxu1  ;;  %v956_v53 = vld [vmem:[%s4402_s2 + $0x230] sm:$0xff] }
 0x1ff   :  { %v615_v56 = vadd.f32 %v614_v55, %v523_v52 }
 0x200   :  { %v662_v57 = vmax.f32 %v620_v54, 0.0  ;;  %v957_v54 = vld [vmem:[%s4402_s2 + $0x238] sm:$0xff] }
 0x201   :  { %v661_v58 = vmax.f32 %v615_v56, 0.0  ;;  %v2843_v59 = vpop.f32.mrb[2].mxu1  ;;  %v3320_v56 = vpack.c.bf16 %v957_v54, %v956_v53  ;;  %v1355_v53 = vld [vmem:[%s4402_s2 + $0x2e0] sm:$0xff]  ;;  %v1356_v54 = vld [vmem:[%s4402_s2 + $0x2e8] sm:$0xff] }
 0x202   :  { %v630_v60 = vadd.f32 %v2843_v59, %v523_v52  ;;  %v624_v61 = vpop.f32.mrb[3].mxu1  ;;  %v959_v59 = vld [vmem:[%s4402_s2 + $0x248] sm:$0xff] }
 0x203   :  { %v3272_v62 = vpack.c.bf16 %v662_v57, %v661_v58  ;;  %v625_v63 = vadd.f32 %v624_v61, %v523_v52  ;;  %v958_v58 = vld [vmem:[%s4402_s2 + $0x240] sm:$0xff]  ;;  %v960_v61 = vld [vmem:[%s4402_s2 + $0x250] sm:$0xff] }
 0x204   :  { %v664_v0 = vmax.f32 %v630_v60, 0.0  ;;  %v3324_v60 = vpack.c.bf16 %v959_v59, %v958_v58  ;;  %v1600_v58 = vld [vmem:[%s4402_s2 + $0x320] sm:$0xff] }
 0x205   :  { %v663_v1 = vmax.f32 %v625_v63, 0.0  ;;  %v2846_v2 = vpop.f32.mrb[4].mxu1  ;;  %3273 = vmatprep.subr.bf16.mxu1 %v3272_v62 }
 0x206   :  { %v640_v3 = vadd.f32 %v2846_v2, %v523_v52  ;;  %v634_v4 = vpop.f32.mrb[5].mxu1  ;;  %3275 = vmatpush3.bf16.msra.mxu1 %v3272_v62  ;;  %v961_v62 = vld [vmem:[%s4402_s2 + $0x258] sm:$0xff] }
 0x207   :  { %v3276_v5 = vpack.c.bf16 %v664_v0, %v663_v1  ;;  %v635_v6 = vadd.f32 %v634_v4, %v523_v52  ;;  %v3328_v63 = vpack.c.bf16 %v961_v62, %v960_v61  ;;  %v962_v0 = vld [vmem:[%s4402_s2 + $0x260] sm:$0xff]  ;;  %v963_v1 = vld [vmem:[%s4402_s2 + $0x268] sm:$0xff]  ;;  %v1276_v4 = vld [vmem:[%s4402_s2 + $0x2b0] sm:$0xff] }
 0x208   :  { %v666_v7 = vmax.f32 %v640_v3, 0.0  ;;  %v3332_v2 = vpack.c.bf16 %v963_v1, %v962_v0  ;;  %v1170_v3 = vld [vmem:[%s4402_s2 + $0x270] sm:$0xff]  ;;  %v1604_v1 = vld [vmem:[%s4402_s2 + $0x340] sm:$0xff] }
 0x209   :  { %v665_v8 = vmax.f32 %v635_v6, 0.0  ;;  %v2849_v9 = vpop.f32.mrb[6].mxu1  ;;  %3277 = vmatprep.subr.bf16.mxu1 %v3276_v5  ;;  %v1278_v6 = vld [vmem:[%s4402_s2 + $0x2c0] sm:$0xff]  ;;  %v1602_v62 = vld [vmem:[%s4402_s2 + $0x330] sm:$0xff] }
 0x20a   :  { %v650_v10 = vadd.f32 %v2849_v9, %v523_v52  ;;  %v644_v11 = vpop.f32.mrb[7].mxu1  ;;  %3279 = vmatpush3.bf16.msra.mxu1 %v3276_v5  ;;  %v1277_v5 = vld [vmem:[%s4402_s2 + $0x2b8] sm:$0xff]  ;;  %v1279_v9 = vld [vmem:[%s4402_s2 + $0x2c8] sm:$0xff] }
 0x20b   :  { %v3280_v12 = vpack.c.bf16 %v666_v7, %v665_v8  ;;  %v645_v13 = vadd.f32 %v644_v11, %v523_v52  ;;  %v3564_v7 = vmov 0.0|0.0   ;;  %v3345_v8 = vpack.c.bf16 %v1277_v5, %v1276_v4  ;;  %v1606_v4 = vld [vmem:[%s4402_s2 + $0x350] sm:$0xff]  ;;  %v1607_v5 = vld [vmem:[%s4402_s2 + $0x358] sm:$0xff] }
 0x20c   :  { %v668_v14 = vmax.f32 %v650_v10, 0.0  ;;  %v3348_v10 = vpack.c.bf16 %v1279_v9, %v1278_v6  ;;  %v1063_v11 = vsub.s32 1, %v3827_v49  ;;  %v3381_v6 = vpack.c.bf16 %v1607_v5, %v1606_v4  ;;  %v1609_v9 = vld [vmem:[%s4402_s2 + $0x368] sm:$0xff]  ;;  %v1725_v5 = vld [vmem:[%s4402_s2 + $0x3e0] sm:$0xff] }
 0x20d   :  { %v667_v15 = vmax.f32 %v645_v13, 0.0  ;;  %3281 = vmatprep.subr.bf16.mxu1 %v3280_v12 }
 0x20e   :  { %3283 = vmatpush3.bf16.msra.mxu1 %v3280_v12  ;;  %v1064_v12 = vrot.slane %v3833_v51, %v1063_v11  ;;  %v1610_v11 = vld [vmem:[%s4402_s2 + $0x370] sm:$0xff] }
 0x20f   :  { %v3284_v16 = vpack.c.bf16 %v668_v14, %v667_v15 }
 0x211   :  { %3285 = vmatprep.subr.bf16.mxu1 %v3284_v16 }
 0x212   :  { %3287 = vmatpush3.bf16.msra.mxu1 %v3284_v16 }
 0x213   :  { %3344 = vmatprep.subr.bf16.mxu1 %v3564_v7 }
 0x215   :  { %2867 = vmatmul.mubr.msk.f32.vlgmr.msra.gmra.mrb[8].mxu1 %vm681_vm1, %v670_v17 }
 0x216   :  { %2869 = vmatprep.mubr.msk.f32.mxu1 %vm681_vm1, %v671_v18  ;;  %3346 = vmatpush3.bf16.msra.mxu1 %v3345_v8  ;;  %v1608_v8 = vld [vmem:[%s4402_s2 + $0x360] sm:$0xff] }
 0x217   :  { %3347 = vmatprep.subr.bf16.mxu1 %v3564_v7 }
 0x219   :  { %2870 = vmatmul.mubr.msk.f32.gmra.mrb[10].mxu1 %vm681_vm1, %v672_v19 }
 0x21a   :  { %2872 = vmatprep.mubr.msk.f32.mxu1 %vm681_vm1, %v673_v20  ;;  %3349 = vmatpush3.bf16.msra.mxu1 %v3348_v10  ;;  %v3384_v10 = vpack.c.bf16 %v1609_v9, %v1608_v8  ;;  %v1727_v9 = vld [vmem:[%s4402_s2 + $0x3f0] sm:$0xff] }
 0x21b   :  { %3350 = vmatprep.subr.bf16.mxu1 %v3564_v7 }
 0x21d   :  { %2873 = vmatmul.mubr.msk.f32.gmra.mrb[12].mxu1 %vm681_vm1, %v674_v21 }
 0x21e   :  { %2875 = vmatprep.mubr.msk.f32.mxu1 %vm681_vm1, %v675_v22 }
 0x221   :  { %2876 = vmatmul.mubr.msk.f32.gmra.mrb[14].mxu1 %vm681_vm1, %v676_v23 }
 0x222   :  { %2878 = vmatprep.mubr.msk.f32.mxu1 %vm681_vm1, %v677_v24 }
 0x225   :  { %2879 = vmatmul.mubr.msk.f32.gmra.mrb[16].mxu1 %vm681_vm1, %v678_v25 }
 0x226   :  { %2881 = vmatprep.mubr.msk.f32.mxu1 %vm681_vm1, %v679_v26 }
 0x229   :  { %2882 = vmatmul.mubr.msk.f32.gmra.mrb[18].mxu1 %vm681_vm1, %v680_v27  ;;  %v1171_v27 = vld [vmem:[%s4402_s2 + $0x278] sm:$0xff] }
 0x2e8   :  { %v2868_v31 = vpop.f32.mrb[8].mxu1 }
 0x2e9   :  { %v784_v32 = vpop.f32.mrb[9].mxu1 }
 0x2ec   :  { %v2871_v33 = vpop.f32.mrb[10].mxu1 }
 0x2ed   :  { %v794_v34 = vpop.f32.mrb[11].mxu1 }
 0x2f0   :  { %v2874_v37 = vpop.f32.mrb[12].mxu1 }
 0x2f1   :  { %v804_v38 = vpop.f32.mrb[13].mxu1 }
 0x2f2   :  { %2900 = vmatprep.mubr.msk.f32.mxu0 %vm681_vm1, %v804_v38 }
 0x2f3   :  { %2901 = vmatmul.mubr.msk.f32.vlgmr.msra.gmra.mrb[24].mxu0 %vm681_vm1, %v2874_v37 }
 0x2f4   :  { %3307 = vmatpush3.bf16.msra.mxu0 %v3304_v30  ;;  %v2877_v42 = vpop.f32.mrb[14].mxu1  ;;  %v3566_v30 = vmov 0.0  }
 0x2f5   :  { %v814_v43 = vpop.f32.mrb[15].mxu1  ;;  %3309 = vmatprep.subr.bf16.mxu0 %v3308_v39  ;;  %2972 = vmatprep.mubr.msk.f32.mxu1 %vm3565_vm3, %v3566_v30 }
 0x2f6   :  { %2903 = vmatprep.mubr.msk.f32.mxu0 %vm681_vm1, %v814_v43 }
 0x2f7   :  { %2904 = vmatmul.mubr.msk.f32.gmra.mrb[26].mxu0 %vm681_vm1, %v2877_v42 }
 0x2f8   :  { %3311 = vmatpush3.bf16.msra.mxu0 %v3308_v39  ;;  %2922 = vmatprep.mubr.msk.f32.mxu0 %vm681_vm1, %v784_v32  ;;  %v2880_v47 = vpop.f32.mrb[16].mxu1  ;;  %v1358_v32 = vld [vmem:[%s4402_s2 + $0x2f8] sm:$0xff]  ;;  %v1272_v39 = vld [vmem:[%s4402_s2 + $0x290] sm:$0xff] }
 0x2f9   :  { %3313 = vmatprep.subr.bf16.mxu0 %v3312_v44  ;;  %v824_v52 = vpop.f32.mrb[17].mxu1  ;;  %v3357_v43 = vpack.c.bf16 %v1273_v40, %v1272_v39  ;;  %v1616_v39 = vsub.s32 3, %v3827_v49 }
 0x2fb   :  { %v1617_v40 = vrot.slane %v3833_v51, %v1616_v39 }
 0x2fc   :  { %3315 = vmatpush3.bf16.msra.mxu0 %v3312_v44  ;;  %v2883_v55 = vpop.f32.mrb[18].mxu1  ;;  %v1274_v44 = vld [vmem:[%s4402_s2 + $0x2a0] sm:$0xff] }
 0x2fd   :  { %3317 = vmatprep.subr.bf16.mxu0 %v3316_v50  ;;  %v834_v57 = vpop.f32.mrb[19].mxu1  ;;  %v3360_v46 = vpack.c.bf16 %v1275_v45, %v1274_v44 }
 0x300   :  { %3319 = vmatpush3.bf16.msra.mxu0 %v3316_v50  ;;  %v1354_v50 = vld [vmem:[%s4402_s2 + $0x2d8] sm:$0xff] }
 0x301   :  { %3321 = vmatprep.subr.bf16.mxu0 %v3320_v56 }
 0x303   :  { %2923 = vmatmul.mubr.msk.f32.vlgmr.msra.gmra.mrb[24].mxu0 %vm681_vm1, %v2868_v31  ;;  %v1357_v31 = vld [vmem:[%s4402_s2 + $0x2f0] sm:$0xff] }
 0x304   :  { %2925 = vmatprep.mubr.msk.f32.mxu0 %vm681_vm1, %v794_v34  ;;  %3323 = vmatpush3.bf16.msra.mxu0 %v3320_v56  ;;  %v1359_v34 = vld [vmem:[%s4402_s2 + $0x300] sm:$0xff]  ;;  %v1598_v56 = vld [vmem:[%s4402_s2 + $0x310] sm:$0xff] }
 0x305   :  { %3325 = vmatprep.subr.bf16.mxu0 %v3324_v60  ;;  %v3354_v38 = vpack.c.bf16 %v1360_v35, %v1359_v34 }
 0x307   :  { %2926 = vmatmul.mubr.msk.f32.gmra.mrb[26].mxu0 %vm681_vm1, %v2871_v33  ;;  %v3351_v33 = vpack.c.bf16 %v1358_v32, %v1357_v31  ;;  %v1586_v32 = vld [vmem:[%s4404_s1] sm:$0xff]  ;;  %s3568_s1 = smov 120  }
 0x308   :  { %3327 = vmatpush3.bf16.msra.mxu0 %v3324_v60  ;;  %2944 = vmatprep.mubr.msk.f32.mxu0 %vm681_vm1, %v824_v52  ;;  %v1601_v60 = vld [vmem:[%s4402_s2 + $0x328] sm:$0xff] }
 0x309   :  { %3329 = vmatprep.subr.bf16.mxu0 %v3328_v63  ;;  %v3372_v61 = vpack.c.bf16 %v1601_v60, %v1600_v58  ;;  %v1719_v60 = vld [vmem:[%s4402_s2 + $0x3b0] sm:$0xff] }
 0x30c   :  { %3331 = vmatpush3.bf16.msra.mxu0 %v3328_v63  ;;  %v1603_v63 = vld [vmem:[%s4402_s2 + $0x338] sm:$0xff] }
 0x30d   :  { %3333 = vmatprep.subr.bf16.mxu0 %v3332_v2  ;;  %v3375_v0 = vpack.c.bf16 %v1603_v63, %v1602_v62  ;;  %v1721_v63 = vld [vmem:[%s4402_s2 + $0x3c0] sm:$0xff] }
 0x310   :  { %3335 = vmatpush3.bf16.msra.mxu0 %v3332_v2  ;;  %v1605_v2 = vld [vmem:[%s4402_s2 + $0x348] sm:$0xff] }
 0x313   :  { %2945 = vmatmul.mubr.msk.f32.vlgmr.msra.gmra.mrb[24].mxu0 %vm681_vm1, %v2880_v47  ;;  %v1353_v47 = vld [vmem:[%s4402_s2 + $0x2d0] sm:$0xff] }
 0x314   :  { %2947 = vmatprep.mubr.msk.f32.mxu0 %vm681_vm1, %v834_v57  ;;  %v3363_v52 = vpack.c.bf16 %v1354_v50, %v1353_v47  ;;  %v1599_v57 = vld [vmem:[%s4402_s2 + $0x318] sm:$0xff]  ;;  %v1715_v50 = vld [vmem:[%s4402_s2 + $0x390] sm:$0xff] }
 0x315   :  { %v3369_v59 = vpack.c.bf16 %v1599_v57, %v1598_v56 }
 0x317   :  { %2948 = vmatmul.mubr.msk.f32.gmra.mrb[26].mxu0 %vm681_vm1, %v2883_v55  ;;  %v3366_v55 = vpack.c.bf16 %v1356_v54, %v1355_v53  ;;  %v1717_v53 = vld [vmem:[%s4402_s2 + $0x3a0] sm:$0xff] }
 0x318   :  { %2958 = vmatprep.mubr.msk.f32.mxu0 %vm1174_vm2, %v1170_v3  ;;  %v3378_v3 = vpack.c.bf16 %v1605_v2, %v1604_v1  ;;  %v1723_v2 = vld [vmem:[%s4402_s2 + $0x3d0] sm:$0xff] }
 0x3e6   :  { %v2946_v13 = vpop.f32.mrb[24].mxu0 }
 0x3e7   :  { %v1149_v14 = vadd.f32 %v2946_v13, %v1064_v12  ;;  %v1143_v15 = vpop.f32.mrb[25].mxu0 }
 0x3e8   :  { %v1144_v16 = vadd.f32 %v1143_v15, %v1064_v12  ;;  %v1613_v15 = vld [vmem:[%s4402_s2 + $0x388] sm:$0xff] }
 0x3e9   :  { %v1167_v17 = vmax.f32 %v1149_v14, 0.0  ;;  %v1612_v14 = vld [vmem:[%s4402_s2 + $0x380] sm:$0xff] }
 0x3ea   :  { %v1166_v18 = vmax.f32 %v1144_v16, 0.0  ;;  %v2949_v19 = vpop.f32.mrb[26].mxu0  ;;  %v3390_v16 = vpack.c.bf16 %v1613_v15, %v1612_v14 }
 0x3eb   :  { %v1159_v20 = vadd.f32 %v2949_v19, %v1064_v12  ;;  %v1153_v21 = vpop.f32.mrb[27].mxu0 }
 0x3ec   :  { %v3336_v22 = vpack.c.bf16 %v1167_v17, %v1166_v18  ;;  %v1154_v23 = vadd.f32 %v1153_v21, %v1064_v12  ;;  %v1611_v12 = vld [vmem:[%s4402_s2 + $0x378] sm:$0xff] }
 0x3ed   :  { %v1169_v24 = vmax.f32 %v1159_v20, 0.0  ;;  %v3387_v13 = vpack.c.bf16 %v1611_v12, %v1610_v11  ;;  %v1729_v12 = vld [vmem:[%s4402_s2 + $0x400] sm:$0xff] }
 0x3ee   :  { %v1168_v25 = vmax.f32 %v1154_v23, 0.0  ;;  %3337 = vmatprep.subr.bf16.mxu0 %v3336_v22 }
 0x3ef   :  { %3339 = vmatpush3.bf16.msra.mxu0 %v3336_v22 }
 0x3f0   :  { %v3340_v26 = vpack.c.bf16 %v1169_v24, %v1168_v25  ;;  %v1583_v24 = vsub.s32 2, %v3827_v49 }
 0x3f2   :  { %3341 = vmatprep.subr.bf16.mxu0 %v3340_v26 }
 0x3f3   :  { %3343 = vmatpush3.bf16.msra.mxu0 %v3340_v26 }
 0x3f4   :  { %3368 = vmatprep.subr.bf16.mxu0 %v3564_v7 }
 0x3f6   :  { %2959 = vmatmul.mubr.msk.f32.vlgmr.msra.gmra.mrb[28].mxu0 %vm1174_vm2, %v1171_v27  ;;  %v1584_v27 = vrot.slane %v3833_v51, %v1583_v24 }
 0x3f7   :  { %2961 = vmatprep.mubr.msk.f32.mxu0 %vm1174_vm2, %v1172_v28  ;;  %3370 = vmatpush3.bf16.msra.mxu0 %v3369_v59 }
 0x3f8   :  { %3371 = vmatprep.subr.bf16.mxu0 %v3564_v7 }
 0x3fa   :  { %2962 = vmatmul.mubr.msk.f32.gmra.mrb[30].mxu0 %vm1174_vm2, %v1173_v29 }
 0x3fb   :  { %3040 = vmatprep.mubr.msk.f32.mxu0 %vm3565_vm3, %v3566_v30  ;;  %3373 = vmatpush3.bf16.msra.mxu0 %v3372_v61  ;;  %v1720_v61 = vld [vmem:[%s4402_s2 + $0x3b8] sm:$0xff] }
 0x3fc   :  { %3374 = vmatprep.subr.bf16.mxu0 %v3564_v7  ;;  %v3399_v62 = vpack.c.bf16 %v1720_v61, %v1719_v60  ;;  %v1845_v60 = vld [vmem:[%s4402_s2 + $0x480] sm:$0xff]  ;;  %v1846_v61 = vld [vmem:[%s4402_s2 + $0x488] sm:$0xff] }
 0x3ff   :  { %3376 = vmatpush3.bf16.msra.mxu0 %v3375_v0  ;;  %v1722_v0 = vld [vmem:[%s4402_s2 + $0x3c8] sm:$0xff] }
 0x400   :  { %3377 = vmatprep.subr.bf16.mxu0 %v3564_v7  ;;  %v3402_v1 = vpack.c.bf16 %v1722_v0, %v1721_v63 }
 0x403   :  { %3379 = vmatpush3.bf16.msra.mxu0 %v3378_v3  ;;  %v1724_v3 = vld [vmem:[%s4402_s2 + $0x3d8] sm:$0xff] }
 0x404   :  { %3380 = vmatprep.subr.bf16.mxu0 %v3564_v7  ;;  %v3405_v4 = vpack.c.bf16 %v1724_v3, %v1723_v2 }
 0x407   :  { %3382 = vmatpush3.bf16.msra.mxu0 %v3381_v6  ;;  %v1726_v6 = vld [vmem:[%s4402_s2 + $0x3e8] sm:$0xff] }
 0x408   :  { %3383 = vmatprep.subr.bf16.mxu0 %v3564_v7  ;;  %v3408_v8 = vpack.c.bf16 %v1726_v6, %v1725_v5 }
 0x40b   :  { %3385 = vmatpush3.bf16.msra.mxu0 %v3384_v10  ;;  %v1728_v10 = vld [vmem:[%s4402_s2 + $0x3f8] sm:$0xff] }
 0x40c   :  { %3386 = vmatprep.subr.bf16.mxu0 %v3564_v7  ;;  %v3411_v11 = vpack.c.bf16 %v1728_v10, %v1727_v9 }
 0x40f   :  { %3388 = vmatpush3.bf16.msra.mxu0 %v3387_v13  ;;  %v1730_v13 = vld [vmem:[%s4402_s2 + $0x408] sm:$0xff] }
 0x410   :  { %3389 = vmatprep.subr.bf16.mxu0 %v3564_v7  ;;  %v3414_v14 = vpack.c.bf16 %v1730_v13, %v1729_v12 }
 0x413   :  { %3391 = vmatpush3.bf16.msra.mxu0 %v3390_v16 }
 0x414   :  { %3416 = vmatprep.subr.bf16.mxu0 %v3564_v7 }
 0x4c9   :  { %v2960_v36 = vpop.f32.mrb[28].mxu0 }
 0x4ca   :  { %v1253_v37 = vpop.f32.mrb[29].mxu0  ;;  %2973 = vmatmul.mubr.msk.f32.vlgmr.msra.gmra.mrb[20].mxu1 %vm1174_vm2, %v2960_v36 }
 0x4cb   :  { %3352 = vmatpush3.bf16.msra.mxu1 %v3351_v33  ;;  %2983 = vmatprep.mubr.msk.f32.mxu1 %vm3565_vm3, %v3566_v30 }
 0x4cc   :  { %3353 = vmatprep.subr.bf16.mxu1 %v3564_v7 }
 0x4cd   :  { %v2963_v41 = vpop.f32.mrb[30].mxu0 }
 0x4ce   :  { %v1263_v42 = vpop.f32.mrb[31].mxu0 }
 0x4cf   :  { %3355 = vmatpush3.bf16.msra.mxu1 %v3354_v38 }
 0x4d0   :  { %3356 = vmatprep.subr.bf16.mxu1 %v3564_v7 }
 0x4d2   :  { %2984 = vmatmul.mubr.msk.f32.vlgmr.msra.gmra.mrb[22].mxu1 %vm1174_vm2, %v2963_v41 }
 0x4d3   :  { %3358 = vmatpush3.bf16.msra.mxu1 %v3357_v43  ;;  %2994 = vmatprep.mubr.msk.f32.mxu1 %vm3565_vm3, %v3566_v30 }
 0x4d4   :  { %3359 = vmatprep.subr.bf16.mxu1 %v3564_v7 }
 0x4d7   :  { %3361 = vmatpush3.bf16.msra.mxu1 %v3360_v46 }
 0x4d8   :  { %3362 = vmatprep.subr.bf16.mxu1 %v3564_v7 }
 0x4da   :  { %2995 = vmatmul.mubr.msk.f32.vlgmr.msra.gmra.mrb[24].mxu1 %vm1174_vm2, %v1253_v37 }
 0x4db   :  { %3364 = vmatpush3.bf16.msra.mxu1 %v3363_v52  ;;  %3005 = vmatprep.mubr.msk.f32.mxu1 %vm3565_vm3, %v3566_v30  ;;  %v1716_v52 = vld [vmem:[%s4402_s2 + $0x398] sm:$0xff] }
 0x4dc   :  { %3365 = vmatprep.subr.bf16.mxu1 %v3564_v7  ;;  %v3393_v54 = vpack.c.bf16 %v1716_v52, %v1715_v50  ;;  %v1839_v50 = vld [vmem:[%s4402_s2 + $0x450] sm:$0xff]  ;;  %v1840_v52 = vld [vmem:[%s4402_s2 + $0x458] sm:$0xff] }
 0x4df   :  { %3367 = vmatpush3.bf16.msra.mxu1 %v3366_v55  ;;  %v1718_v55 = vld [vmem:[%s4402_s2 + $0x3a8] sm:$0xff] }
 0x4e0   :  { %3392 = vmatprep.subr.bf16.mxu1 %v3564_v7  ;;  %v3396_v58 = vpack.c.bf16 %v1718_v55, %v1717_v53  ;;  %v3429_v53 = vpack.c.bf16 %v1840_v52, %v1839_v50  ;;  %v1842_v55 = vld [vmem:[%s4402_s2 + $0x468] sm:$0xff]  ;;  %v1959_v52 = vsub.s32 6, %v3827_v49 }
 0x4e2   :  { %3006 = vmatmul.mubr.msk.f32.vlgmr.msra.gmra.mrb[26].mxu1 %vm1174_vm2, %v1263_v42 }
 0x4e3   :  { %3075 = vmatprep.mubr.msk.f32.mxu1 %vm3565_vm3, %v3566_v30  ;;  %3394 = vmatpush3.bf16.msra.mxu1 %v3393_v54  ;;  %v1841_v54 = vld [vmem:[%s4402_s2 + $0x460] sm:$0xff] }
 0x4e4   :  { %3395 = vmatprep.subr.bf16.mxu1 %v3564_v7 }
 0x4e7   :  { %3397 = vmatpush3.bf16.msra.mxu1 %v3396_v58  ;;  %v1844_v58 = vld [vmem:[%s4402_s2 + $0x478] sm:$0xff] }
 0x4e8   :  { %3398 = vmatprep.subr.bf16.mxu1 %v3564_v7 }
 0x4eb   :  { %3400 = vmatpush3.bf16.msra.mxu1 %v3399_v62  ;;  %v3438_v62 = vpack.c.bf16 %v1846_v61, %v1845_v60 }
 0x4ec   :  { %3401 = vmatprep.subr.bf16.mxu1 %v3564_v7 }
 0x4ef   :  { %3403 = vmatpush3.bf16.msra.mxu1 %v3402_v1 }
 0x4f0   :  { %3404 = vmatprep.subr.bf16.mxu1 %v3564_v7 }
 0x4f3   :  { %3406 = vmatpush3.bf16.msra.mxu1 %v3405_v4 }
 0x4f4   :  { %3407 = vmatprep.subr.bf16.mxu1 %v3564_v7 }
 0x4f7   :  { %3409 = vmatpush3.bf16.msra.mxu1 %v3408_v8  ;;  %v1849_v8 = vsub.s32 5, %v3827_v49 }
 0x4f8   :  { %3410 = vmatprep.subr.bf16.mxu1 %v3564_v7 }
 0x4f9   :  { %v1850_v9 = vrot.slane %v3833_v51, %v1849_v8  ;;  %v2209_v8 = vld [vmem:[%s4402_s2 + $0x510] sm:$0xff] }
 0x4fb   :  { %3412 = vmatpush3.bf16.msra.mxu1 %v3411_v11 }
 0x4fc   :  { %3413 = vmatprep.subr.bf16.mxu1 %v3564_v7 }
 0x4ff   :  { %3415 = vmatpush3.bf16.msra.mxu1 %v3414_v14 }
 0x500   :  { %3440 = vmatprep.subr.bf16.mxu1 %v3564_v7 }
 0x59d   :  { %v1349_v17 = vpop.f32.mrb[20].mxu1 }
 0x59e   :  { %v2974_v18 = vpop.f32.mrb[21].mxu1 }
 0x5a5   :  { %v1430_v19 = vpop.f32.mrb[22].mxu1 }
 0x5a6   :  { %v2985_v20 = vpop.f32.mrb[23].mxu1 }
 0x5ad   :  { %v1503_v21 = vpop.f32.mrb[24].mxu1 }
 0x5ae   :  { %v1504_v22 = vadd.f32 %v1503_v21, %v1349_v17  ;;  %v2996_v23 = vpop.f32.mrb[25].mxu1 }
 0x5af   :  { %v1733_v23 = vsub.s32 4, %v3827_v49 }
 0x5b1   :  { %v1734_v24 = vrot.slane %v3833_v51, %v1733_v23  ;;  %v1946_v23 = vld [vmem:[%s4402_s2 + $0x4b8] sm:$0xff] }
 0x5b5   :  { %v1576_v25 = vpop.f32.mrb[26].mxu1 }
 0x5b6   :  { %v1577_v26 = vadd.f32 %v1576_v25, %v1430_v19  ;;  %v3007_v28 = vpop.f32.mrb[27].mxu1 }
 0x5b8   :  { %v1580_v29 = vadd.f32 %v1577_v26, %v1504_v22 }
 0x5ba   :  { %v1585_v31 = vadd.f32 %v1584_v27, %v1580_v29 }
 0x5bc   :  { %v1588_v33 = vsel %vm1587_vm4, %v1585_v31, 0.0 }
 0x5bd   :  { %v4093_v34 = vadd.f32 %v1588_v33, %v1586_v32  ;;  %v1831_v33 = vld [vmem:[%s4402_s2 + $0x410] sm:$0xff] }
 0x5bf   :  { %v1592_v35 = vrot.slane %v4093_v34, 7 }
 0x5c1   :  { %v1594_v36 = vsel %vm1593_vm5, %v1592_v35, 0.0  ;;  %v1833_v35 = vld [vmem:[%s4402_s2 + $0x420] sm:$0xff] }
 0x5c2   :  { %1595 = vrot.lane.b32.xlu0 %v1594_v36, %s3567_s10 }
 0x634   :  { %v1596_v37 = vpop.permute.xlu0 %1595 }
 0x635   :  { %v1597_v38 = vadd.f32 %v1596_v37, %v4093_v34  ;;  %v1834_v37 = vld [vmem:[%s4402_s2 + $0x428] sm:$0xff] }
 0x637   :  { %3041 = vmatmul.mubr.f32.vlgmr.msra.gmra.mrb[32].mxu0 %v1597_v38 }
 0x638   :  { %3110 = vmatprep.mubr.msk.f32.mxu0 %vm3565_vm3, %v3566_v30 }
 0x70a   :  { %v1684_v41 = vpop.f32.mrb[32].mxu0 }
 0x70b   :  { %v1685_v42 = vadd.f32 %v1684_v41, %v1617_v40  ;;  %v3042_v43 = vpop.f32.mrb[33].mxu0  ;;  %v3420_v40 = vpack.c.bf16 %v1834_v37, %v1833_v35  ;;  %v1954_v37 = vld [vmem:[%s4402_s2 + $0x4f8] sm:$0xff] }
 0x70c   :  { %v1836_v43 = vld [vmem:[%s4402_s2 + $0x438] sm:$0xff] }
 0x70d   :  { %v2443_v44 = vmul.f32 -1.442695, %v1685_v42 }
 0x70f   :  { %3541 = vpow2.f32 %v2443_v44 }
 0x719   :  { %v3542_v45 = vpop.eup %3541 }
 0x71a   :  { %v1692_v46 = vadd.f32 1.0, %v3542_v45  ;;  %v1837_v45 = vld [vmem:[%s4402_s2 + $0x440] sm:$0xff] }
 0x71c   :  { %3543 = vrcp.f32 %v1692_v46  ;;  %v1838_v46 = vld [vmem:[%s4402_s2 + $0x448] sm:$0xff] }
 0x71d   :  { %3545 = vtanh.f32 %v1685_v42  ;;  %v1835_v42 = vld [vmem:[%s4402_s2 + $0x430] sm:$0xff] }
 0x71e   :  { %v3423_v44 = vpack.c.bf16 %v1836_v43, %v1835_v42 }
 0x726   :  { %v3544_v47 = vpop.eup %3543 }
 0x727   :  { %1696 = vrot.lane.b32.xlu0 %v3544_v47, %s3568_s1  ;;  %v3546_v56 = vpop.eup %3545  ;;  %v3426_v47 = vpack.c.bf16 %v1838_v46, %v1837_v45 }
 0x799   :  { %v1697_v57 = vpop.permute.xlu0 %1696 }
 0x79a   :  { %v1699_v59 = vmul.f32 %v3546_v56, %v1697_v57  ;;  %v3432_v56 = vpack.c.bf16 %v1842_v55, %v1841_v54  ;;  %v1843_v57 = vld [vmem:[%s4402_s2 + $0x470] sm:$0xff] }
 0x79c   :  { %1701 = vrot.lane.b32.xlu1 %v1699_v59, %s3569_s23  ;;  %v3435_v59 = vpack.c.bf16 %v1844_v58, %v1843_v57  ;;  %v2111_v58 = vand.u32 127, %v520_v48 }
 0x79e   :  { %vm2112_vm13 = vcmp.le.s32.totalorder %v2111_v58, %v3827_v49 }
 0x80e   :  { %v1702_v15 = vpop.permute.xlu1 %1701 }
 0x80f   :  { %v1705_v16 = vsel %vm1704_vm6, 0.0, %v1702_v15 }
 0x810   :  { %v1707_v17 = vsel %vm1706_vm7, %v1705_v16, 0.0  ;;  %v1941_v16 = vld [vmem:[%s4402_s2 + $0x490] sm:$0xff] }
 0x811   :  { %v4162_v18 = vadd.f32 %v1707_v17, %v4093_v34  ;;  %v1832_v34 = vld [vmem:[%s4402_s2 + $0x418] sm:$0xff] }
 0x812   :  { %v3417_v36 = vpack.c.bf16 %v1832_v34, %v1831_v33  ;;  %v1942_v17 = vld [vmem:[%s4402_s2 + $0x498] sm:$0xff]  ;;  %v1951_v33 = vld [vmem:[%s4402_s2 + $0x4e0] sm:$0xff]  ;;  %v1952_v34 = vld [vmem:[%s4402_s2 + $0x4e8] sm:$0xff] }
 0x813   :  { %v1709_v19 = vrot.slane %v4162_v18, 6  ;;  %v3456_v35 = vpack.c.bf16 %v1952_v34, %v1951_v33  ;;  %v2301_v33 = vld [vmem:[%s4402_s2 + $0x598] sm:$0xff] }
 0x814   :  { %3418 = vmatpush3.bf16.msra.mxu0 %v3417_v36  ;;  %v1953_v36 = vld [vmem:[%s4402_s2 + $0x4f0] sm:$0xff] }
 0x815   :  { %v1711_v20 = vsel %vm1710_vm8, %v1709_v19, 0.0  ;;  %3419 = vmatprep.subr.bf16.mxu0 %v3564_v7  ;;  %v3441_v19 = vpack.c.bf16 %v1942_v17, %v1941_v16  ;;  %v2215_v16 = vld [vmem:[%s4402_s2 + $0x540] sm:$0xff]  ;;  %v2216_v17 = vld [vmem:[%s4402_s2 + $0x548] sm:$0xff] }
 0x816   :  { %1712 = vrot.lane.b32.xlu1 %v1711_v20, %s3567_s10  ;;  %v1944_v20 = vld [vmem:[%s4402_s2 + $0x4a8] sm:$0xff] }
 0x818   :  { %3421 = vmatpush3.bf16.msra.mxu0 %v3420_v40  ;;  %v1956_v40 = vld [vmem:[%s4402_s2 + $0x508] sm:$0xff] }
 0x819   :  { %3422 = vmatprep.subr.bf16.mxu0 %v3564_v7 }
 0x81c   :  { %3424 = vmatpush3.bf16.msra.mxu0 %v3423_v44 }
 0x81d   :  { %3425 = vmatprep.subr.bf16.mxu0 %v3564_v7 }
 0x820   :  { %3427 = vmatpush3.bf16.msra.mxu0 %v3426_v47 }
 0x821   :  { %3428 = vmatprep.subr.bf16.mxu0 %v3564_v7 }
 0x824   :  { %3430 = vmatpush3.bf16.msra.mxu0 %v3429_v53  ;;  %v1960_v53 = vrot.slane %v3833_v51, %v1959_v52 }
 0x825   :  { %3431 = vmatprep.subr.bf16.mxu0 %v3564_v7 }
 0x828   :  { %3433 = vmatpush3.bf16.msra.mxu0 %v3432_v56 }
 0x829   :  { %3434 = vmatprep.subr.bf16.mxu0 %v3564_v7 }
 0x82c   :  { %3436 = vmatpush3.bf16.msra.mxu0 %v3435_v59 }
 0x82d   :  { %3437 = vmatprep.subr.bf16.mxu0 %v3564_v7 }
 0x830   :  { %3439 = vmatpush3.bf16.msra.mxu0 %v3438_v62 }
 0x831   :  { %3148 = vmatprep.subr.mxu0 %v3566_v30 }
 0x888   :  { %v1713_v21 = vpop.permute.xlu1 %1712 }
 0x889   :  { %v1714_v22 = vadd.f32 %v1713_v21, %v4162_v18 }
 0x88b   :  { %3076 = vmatmul.mubr.f32.vlgmr.msra.gmra.mrb[28].mxu1 %v1714_v22  ;;  %v1945_v22 = vld [vmem:[%s4402_s2 + $0x4b0] sm:$0xff] }
 0x88c   :  { %3145 = vmatprep.mubr.msk.f32.mxu1 %vm3565_vm3, %v3566_v30  ;;  %3442 = vmatpush3.bf16.msra.mxu1 %v3441_v19  ;;  %v2217_v19 = vld [vmem:[%s4402_s2 + $0x550] sm:$0xff] }
 0x88d   :  { %3443 = vmatprep.subr.bf16.mxu1 %v3564_v7 }
 0x95e   :  { %v1801_v25 = vpop.f32.mrb[28].mxu1 }
 0x95f   :  { %v1802_v26 = vadd.f32 %v1801_v25, %v1734_v24  ;;  %v3077_v27 = vpop.f32.mrb[29].mxu1  ;;  %v3447_v24 = vpack.c.bf16 %v1946_v23, %v1945_v22  ;;  %v1947_v25 = vld [vmem:[%s4402_s2 + $0x4c0] sm:$0xff]  ;;  %v2220_v23 = vld [vmem:[%s4402_s2 + $0x568] sm:$0xff] }
 0x960   :  { %v2219_v22 = vld [vmem:[%s4402_s2 + $0x560] sm:$0xff] }
 0x961   :  { %v2444_v28 = vmul.f32 -1.442695, %v1802_v26 }
 0x963   :  { %3547 = vpow2.f32 %v2444_v28 }
 0x96d   :  { %v3548_v29 = vpop.eup %3547 }
 0x96e   :  { %v1809_v31 = vadd.f32 1.0, %v3548_v29  ;;  %v1949_v29 = vld [vmem:[%s4402_s2 + $0x4d0] sm:$0xff] }
 0x970   :  { %3549 = vrcp.f32 %v1809_v31  ;;  %v1950_v31 = vld [vmem:[%s4402_s2 + $0x4d8] sm:$0xff] }
 0x971   :  { %3551 = vtanh.f32 %v1802_v26  ;;  %v1948_v26 = vld [vmem:[%s4402_s2 + $0x4c8] sm:$0xff] }
 0x972   :  { %v3450_v28 = vpack.c.bf16 %v1948_v26, %v1947_v25  ;;  %v2221_v25 = vld [vmem:[%s4402_s2 + $0x570] sm:$0xff]  ;;  %v2222_v26 = vld [vmem:[%s4402_s2 + $0x578] sm:$0xff] }
 0x97a   :  { %v3550_v32 = vpop.eup %3549 }
 0x97b   :  { %1813 = vrot.lane.b32.xlu0 %v3550_v32, %s3568_s1  ;;  %v3552_v38 = vpop.eup %3551  ;;  %v3453_v32 = vpack.c.bf16 %v1950_v31, %v1949_v29  ;;  %v2224_v29 = vld [vmem:[%s4402_s2 + $0x588] sm:$0xff] }
 0x9ed   :  { %v1814_v39 = vpop.permute.xlu0 %1813 }
 0x9ee   :  { %v1816_v41 = vmul.f32 %v3552_v38, %v1814_v39  ;;  %v3459_v38 = vpack.c.bf16 %v1954_v37, %v1953_v36  ;;  %v1955_v39 = vld [vmem:[%s4402_s2 + $0x500] sm:$0xff] }
 0x9f0   :  { %1818 = vrot.lane.b32.xlu1 %v1816_v41, %s3570_s29  ;;  %v3462_v41 = vpack.c.bf16 %v1956_v40, %v1955_v39 }
 0xa62   :  { %v1819_v63 = vpop.permute.xlu1 %1818 }
 0xa63   :  { %v1821_v0 = vsel %vm1706_vm7, 0.0, %v1819_v63 }
 0xa64   :  { %v1823_v1 = vsel %vm1822_vm9, %v1821_v0, 0.0 }
 0xa65   :  { %v4232_v2 = vadd.f32 %v1823_v1, %v4162_v18  ;;  %v1943_v18 = vld [vmem:[%s4402_s2 + $0x4a0] sm:$0xff] }
 0xa66   :  { %v3444_v21 = vpack.c.bf16 %v1944_v20, %v1943_v18  ;;  %v3474_v18 = vpack.c.bf16 %v2216_v17, %v2215_v16  ;;  %v2218_v20 = vld [vmem:[%s4402_s2 + $0x558] sm:$0xff] }
 0xa67   :  { %v1825_v3 = vrot.slane %v4232_v2, 4 }
 0xa68   :  { %3445 = vmatpush3.bf16.msra.mxu1 %v3444_v21  ;;  %v3477_v21 = vpack.c.bf16 %v2218_v20, %v2217_v19 }
 0xa69   :  { %v1827_v4 = vsel %vm1826_vm10, %v1825_v3, 0.0  ;;  %3446 = vmatprep.subr.bf16.mxu1 %v3564_v7 }
 0xa6a   :  { %1828 = vrot.lane.b32.xlu0 %v1827_v4, %s3567_s10 }
 0xa6c   :  { %3448 = vmatpush3.bf16.msra.mxu1 %v3447_v24  ;;  %v3480_v24 = vpack.c.bf16 %v2220_v23, %v2219_v22 }
 0xa6d   :  { %3449 = vmatprep.subr.bf16.mxu1 %v3564_v7 }
 0xa70   :  { %3451 = vmatpush3.bf16.msra.mxu1 %v3450_v28  ;;  %v2223_v28 = vld [vmem:[%s4402_s2 + $0x580] sm:$0xff] }
 0xa71   :  { %3452 = vmatprep.subr.bf16.mxu1 %v3564_v7  ;;  %v3486_v31 = vpack.c.bf16 %v2224_v29, %v2223_v28 }
 0xa74   :  { %3454 = vmatpush3.bf16.msra.mxu1 %v3453_v32  ;;  %v2300_v32 = vld [vmem:[%s4402_s2 + $0x590] sm:$0xff] }
 0xa75   :  { %3455 = vmatprep.subr.bf16.mxu1 %v3564_v7  ;;  %v3489_v34 = vpack.c.bf16 %v2301_v33, %v2300_v32 }
 0xa78   :  { %3457 = vmatpush3.bf16.msra.mxu1 %v3456_v35 }
 0xa79   :  { %3458 = vmatprep.subr.bf16.mxu1 %v3564_v7 }
 0xa7c   :  { %3460 = vmatpush3.bf16.msra.mxu1 %v3459_v38 }
 0xa7d   :  { %3461 = vmatprep.subr.bf16.mxu1 %v3564_v7 }
 0xa80   :  { %3463 = vmatpush3.bf16.msra.mxu1 %v3462_v41  ;;  %v2302_v41 = vld [vmem:[%s4402_s2 + $0x5a0] sm:$0xff] }
 0xa81   :  { %3464 = vmatprep.subr.bf16.mxu1 %v3564_v7 }
 0xadc   :  { %v1829_v5 = vpop.permute.xlu0 %1828 }
 0xadd   :  { %v1830_v6 = vadd.f32 %v1829_v5, %v4232_v2 }
 0xadf   :  { %3111 = vmatmul.mubr.f32.vlgmr.msra.gmra.mrb[34].mxu0 %v1830_v6 }
 0xae0   :  { %3150 = vmatprep.mubr.msk.f32.mxu0 %vm3565_vm3, %v3566_v30 }
 0xbb2   :  { %v1917_v10 = vpop.f32.mrb[34].mxu0 }
 0xbb3   :  { %v1918_v11 = vadd.f32 %v1917_v10, %v1850_v9  ;;  %v3112_v12 = vpop.f32.mrb[35].mxu0  ;;  %v2210_v9 = vld [vmem:[%s4402_s2 + $0x518] sm:$0xff]  ;;  %v2211_v10 = vld [vmem:[%s4402_s2 + $0x520] sm:$0xff] }
 0xbb4   :  { %v2212_v12 = vld [vmem:[%s4402_s2 + $0x528] sm:$0xff] }
 0xbb5   :  { %v2445_v13 = vmul.f32 -1.442695, %v1918_v11 }
 0xbb7   :  { %3553 = vpow2.f32 %v2445_v13  ;;  %v3468_v13 = vpack.c.bf16 %v2212_v12, %v2211_v10 }
 0xbc1   :  { %v3554_v14 = vpop.eup %3553 }
 0xbc2   :  { %v1925_v15 = vadd.f32 1.0, %v3554_v14  ;;  %v2214_v14 = vld [vmem:[%s4402_s2 + $0x538] sm:$0xff] }
 0xbc4   :  { %3555 = vrcp.f32 %v1925_v15 }
 0xbc5   :  { %3557 = vtanh.f32 %v1918_v11  ;;  %v3465_v11 = vpack.c.bf16 %v2210_v9, %v2209_v8 }
 0xbce   :  { %v3556_v27 = vpop.eup %3555 }
 0xbcf   :  { %1929 = vrot.lane.b32.xlu1 %v3556_v27, %s3568_s1  ;;  %v3558_v42 = vpop.eup %3557  ;;  %v3483_v27 = vpack.c.bf16 %v2222_v26, %v2221_v25 }
 0xc41   :  { %v1930_v43 = vpop.permute.xlu1 %1929 }
 0xc42   :  { %v1932_v44 = vmul.f32 %v3558_v42, %v1930_v43  ;;  %v2227_v42 = vsub.s32 7, %v3827_v49 }
 0xc44   :  { %1934 = vrot.lane.b32.xlu0 %v1932_v44, %s3571_s0  ;;  %v3563_v44 = vld [vmem:[%s4403_s3] sm:$0xff] }
 0xcb6   :  { %v1935_v45 = vpop.permute.xlu0 %1934 }
 0xcb7   :  { %v1937_v46 = vsel %vm1822_vm9, 0.0, %v1935_v45  ;;  %v2228_v45 = vrot.slane %v3563_v44, %v2227_v42 }
 0xcb8   :  { %v1939_v47 = vsel %vm1938_vm11, %v1937_v46, 0.0 }
 0xcb9   :  { %v4302_v50 = vadd.f32 %v1939_v47, %v4232_v2 }
 0xcbb   :  { %3146 = vmatmul.mubr.f32.vlgmr.msra.gmra.mrb[30].mxu1 %v4302_v50 }
 0xcbc   :  { %3190 = vmatprep.mubr.msk.f32.mxu1 %vm3565_vm3, %v3566_v30  ;;  %3466 = vmatpush3.bf16.msra.mxu1 %v3465_v11 }
 0xcbd   :  { %3467 = vmatprep.subr.bf16.mxu1 %v3564_v7 }
 0xcc0   :  { %3469 = vmatpush3.bf16.msra.mxu1 %v3468_v13 }
 0xcc1   :  { %3470 = vmatprep.subr.bf16.mxu1 %v3564_v7 }
 0xd8e   :  { %v2027_v54 = vpop.f32.mrb[30].mxu1 }
 0xd8f   :  { %v2028_v55 = vadd.f32 %v2027_v54, %v1960_v53  ;;  %v3147_v56 = vpop.f32.mrb[31].mxu1 }
 0xd91   :  { %2032 = vrot.lane.b32.xlu1 %v2028_v55, %s3568_s1  ;;  %s3572_s1 = smov 112  }
 0xe03   :  { %v2033_v57 = vpop.permute.xlu1 %2032 }
 0xe04   :  { %3149 = vmatpush3.xpose.msk.msra.mxu0 %vm2034_vm12, %v2033_v57 }
 0xe05   :  { %3153 = vmatprep.subr.mxu0 %v3566_v30 }
 0xe07   :  { %3151 = vmatmul.mubr.msk.f32.vlgmr.msra.gmra.mrb[36].mxu0 %vm2034_vm12, %v2028_v55 }
 0xe08   :  { %3155 = vmatprep.mubr.msk.f32.mxu0 %vm3565_vm3, %v3566_v30 }
 0xeda   :  { %v2105_v59 = vpop.f32.mrb[36].mxu0 }
 0xedb   :  { %v2109_v51 = vmul.f32 0.35355338, %v2105_v59  ;;  %v3152_v60 = vpop.f32.mrb[37].mxu0 }
 0xedd   :  { %v2113_v61 = vsel %vm2112_vm13, %v2109_v51, -1e+30 }
 0xede   :  { %v2114_v62 = vsel %vm2034_vm12, %v2113_v61, -inf }
 0xedf   :  { %2115 = vmax.xlane.f32.xlu0 %v2114_v62 }
 0xef5   :  { %2125 = vrot.lane.b32.xlu0 %v2028_v55, %s3572_s1 }
 0xef9   :  { %2305 = vrot.lane.b32.xlu0 %v2228_v45, %s3574_s19 }
 0xf6c   :  { %v2116_v63 = vpop.xlane.xlu0 %2115 }
 0xf6d   :  { %v2117_v0 = vsub.f32 %v2113_v61, %v2116_v63 }
 0xf6f   :  { %v2118_v1 = vmul.f32 1.442695, %v2117_v0 }
 0xf70   :  { %v2126_v2 = vpop.permute.xlu0 %2125 }
 0xf71   :  { %3559 = vpow2.f32 %v2118_v1  ;;  %3154 = vmatpush3.msra.mxu0 %v2126_v2 }
 0xf72   :  { %3488 = vmatprep.subr.bf16.mxu0 %v3564_v7 }
 0xf74   :  { %v2306_v53 = vpop.permute.xlu0 %2305 }
 0xf7b   :  { %v3560_v48 = vpop.eup %3559 }
 0xf7c   :  { %v2120_v3 = vsel %vm2034_vm12, %v3560_v48, 0.0 }
 0xf7d   :  { %2121 = vadd.xlane.f32.xlu1 %v2120_v3 }
0x100a   :  { %v2122_v4 = vpop.xlane.xlu1 %2121 }
0x100b   :  { %3561 = vrcp.f32 %v2122_v4 }
0x1015   :  { %v3562_v5 = vpop.eup %3561 }
0x1016   :  { %v2124_v6 = vmul.f32 %v3562_v5, %v3560_v48 }
0x1018   :  { %3156 = vmatmul.mubr.msk.f32.vlgmr.msra.gmra.mrb[38].mxu0 %vm2034_vm12, %v2124_v6 }
0x1019   :  { %3201 = vmatprep.mubr.msk.f32.mxu0 %vm3565_vm3, %v3566_v30  ;;  %v2213_v30 = vld [vmem:[%s4402_s2 + $0x530] sm:$0xff]  ;;  %3490 = vmatpush3.bf16.msra.mxu0 %v3489_v34 }
0x101a   :  { %v3471_v15 = vpack.c.bf16 %v2214_v14, %v2213_v30  ;;  %3491 = vmatprep.subr.bf16.mxu0 %v3564_v7 }
0x101c   :  { %3472 = vmatpush3.bf16.msra.mxu1 %v3471_v15 }
0x101d   :  { %3473 = vmatprep.subr.bf16.mxu1 %v3564_v7 }
0x1020   :  { %3475 = vmatpush3.bf16.msra.mxu1 %v3474_v18 }
0x1021   :  { %3476 = vmatprep.subr.bf16.mxu1 %v3564_v7 }
0x1024   :  { %3478 = vmatpush3.bf16.msra.mxu1 %v3477_v21 }
0x1025   :  { %3479 = vmatprep.subr.bf16.mxu1 %v3564_v7 }
0x1028   :  { %3481 = vmatpush3.bf16.msra.mxu1 %v3480_v24 }
0x1029   :  { %3482 = vmatprep.subr.bf16.mxu1 %v3564_v7 }
0x102c   :  { %3484 = vmatpush3.bf16.msra.mxu1 %v3483_v27 }
0x102d   :  { %3485 = vmatprep.subr.bf16.mxu1 %v3564_v7  ;;  %v2303_v7 = vld [vmem:[%s4402_s2 + $0x5a8] sm:$0xff] }
0x102e   :  { %v3492_v43 = vpack.c.bf16 %v2303_v7, %v2302_v41 }
0x1030   :  { %3487 = vmatpush3.bf16.msra.mxu1 %v3486_v31  ;;  %3493 = vmatpush3.bf16.msra.mxu0 %v3492_v43 }
0x10eb   :  { %v2197_v35 = vpop.f32.mrb[38].mxu0 }
0x10ec   :  { %2202 = vrot.lane.b32.xlu1 %v2197_v35, %s3573_s12  ;;  %v3157_v36 = vpop.f32.mrb[39].mxu0 }
0x115e   :  { %v2203_v37 = vpop.permute.xlu1 %2202 }
0x115f   :  { %v2205_v38 = vsel %vm1938_vm11, 0.0, %v2203_v37 }
0x1160   :  { %v2207_v39 = vsel %vm2206_vm14, %v2205_v38, 0.0 }
0x1161   :  { %v2208_v40 = vadd.f32 %v2207_v39, %v4302_v50 }
0x1163   :  { %3191 = vmatmul.mubr.f32.vlgmr.msra.gmra.mrb[32].mxu1 %v2208_v40 }
0x1236   :  { %v2295_v46 = vpop.f32.mrb[32].mxu1 }
0x1237   :  { %v2296_v47 = vadd.f32 %v2295_v46, %v2228_v45  ;;  %v3192_v50 = vpop.f32.mrb[33].mxu1 }
0x1239   :  { %v2299_v52 = vmax.f32 %v2296_v47, 0.0 }
0x123b   :  { %3202 = vmatmul.mubr.msk.f32.vlgmr.msra.gmra.mrb[40].mxu0 %vm1174_vm2, %v2299_v52 }
0x130e   :  { %v2377_v54 = vpop.f32.mrb[40].mxu0 }
0x130f   :  { %v2378_v55 = vadd.f32 %v2377_v54, %v2306_v53  ;;  %v3203_v49 = vpop.f32.mrb[41].mxu0 }
0x1311   :  { %2382 = vst.msk [vmem:[%s4405_s4] sm:$0xff] %vm2381_vm15, %v2378_v55 }

</bundles_post_ra>
